<compile_context>
chip_gen: v7x
topology: tpu7x:2x2x1
jax: 0.10.0
libtpu: 0.0.40
codegen_flags: <defaults>
</compile_context>

<pallas_src>
import functools

import jax
import jax.numpy as jnp
from jax.experimental import pallas as pl
from jax.experimental.pallas import tpu as pltpu


# ----------------------------- shared helpers --------------------------------

def _layernorm(x, g, b, eps=1e-5):
    # x: (T, D) f32 ; g, b: (1, D) f32  -- torch.nn.LayerNorm semantics
    mu = jnp.mean(x, axis=-1, keepdims=True)
    xc = x - mu
    var = jnp.mean(xc * xc, axis=-1, keepdims=True)
    return xc * jax.lax.rsqrt(var + eps) * g + b


def _pick_tile(dim, target):
    """Largest divisor of `dim` that is <= target (halving search); full dim
    fallback.  target defaults are 256-multiples (v6e/v7x MXU friendly)."""
    if dim <= target:
        return dim
    t = target
    while t >= 8:
        if dim % t == 0:
            return t
        t //= 2
    return dim


def _wspec(shape):
    # Grid-invariant weight / param block: fetched once, single-buffered so it
    # does not waste VMEM on a second buffer (review item).
    return pl.BlockSpec(shape, lambda b, i, j: (0, 0),
                        pipeline_mode=pl.Buffered(buffer_count=1))


# ----------------------------- attention kernel ------------------------------

def _mha_kernel(xq_ref, xkv_ref, ln1g_ref, ln1b_ref, wq_ref, wk_ref, wv_ref,
                wp_ref, bp_ref, o_ref, q_scr, m_scr, l_scr, acc_scr,
                *, num_heads, head_dim):
    """Fused LayerNorm + flash-style MHA + residual for one (batch, q-tile),
    iterated over kv tiles on the innermost ('arbitrary') grid axis."""
    H, dh = num_heads, head_dim
    tq = xq_ref.shape[1]
    tk = xkv_ref.shape[1]
    ki = pl.program_id(2)
    cdt = wq_ref.dtype                      # compute dtype (bf16 in production)

    @pl.when(ki == 0)
    def _():
        xn_q = _layernorm(xq_ref[0].astype(jnp.float32),
                          ln1g_ref[...], ln1b_ref[...])
        # (P, D) x (tq, D) contracting D -> (P, tq): transposed q; head split is a
        # free leading-axis reshape (no swapaxes / lane relayout).  1/sqrt(dh) is
        # already folded into wq at parameter-prep time.
        q_t = jax.lax.dot_general(wq_ref[...], xn_q.astype(cdt),
                                  (((1,), (1,)), ((), ())),
                                  preferred_element_type=jnp.float32)
        q_scr[...] = q_t.reshape(H, dh, tq).astype(cdt)
        m_scr[...] = jnp.full(m_scr.shape, -jnp.inf, jnp.float32)
        l_scr[...] = jnp.zeros(l_scr.shape, jnp.float32)
        acc_scr[...] = jnp.zeros(acc_scr.shape, jnp.float32)

    # k/v projections for this kv tile, also in transposed (H, dh, tk) form.
    xn_kv = _layernorm(xkv_ref[0].astype(jnp.float32),
                       ln1g_ref[...], ln1b_ref[...]).astype(cdt)
    k_h = jax.lax.dot_general(wk_ref[...], xn_kv, (((1,), (1,)), ((), ())),
                              preferred_element_type=jnp.float32
                              ).reshape(H, dh, tk).astype(cdt)
    v_h = jax.lax.dot_general(wv_ref[...], xn_kv, (((1,), (1,)), ((), ())),
                              preferred_element_type=jnp.float32
                              ).reshape(H, dh, tk).astype(cdt)

    # Scores: batched over heads, contracting dh on both (H, dh, t) operands
    # (review recipe -- no per-head relayouts, MXU-native transposed form).
    s = jax.lax.dot_general(q_scr[...], k_h, (((1,), (1,)), ((0,), (0,))),
                            preferred_element_type=jnp.float32)      # (H, tq, tk)

    # Online (flash) softmax update in f32.
    m_prev = m_scr[...]
    m_new = jnp.maximum(m_prev, jnp.max(s, axis=-1, keepdims=True))
    alpha = jnp.exp(m_prev - m_new)
    p = jnp.exp(s - m_new)
    l_scr[...] = alpha * l_scr[...] + jnp.sum(p, axis=-1, keepdims=True)
    # p @ v^T contracting the kv dim (last of both); acc stays (H, tq, dh) so the
    # per-row rescale broadcasts along lanes.
    pv = jax.lax.dot_general(p.astype(cdt), v_h, (((2,), (2,)), ((0,), (0,))),
                             preferred_element_type=jnp.float32)     # (H, tq, dh)
    acc_scr[...] = alpha * acc_scr[...] + pv
    m_scr[...] = m_new

    @pl.when(ki == pl.num_programs(2) - 1)
    def _():
        # Exact reciprocal: keeps parity with the f32 reference (review note).
        o = (acc_scr[...] * pl.reciprocal(l_scr[...], approx=False)).astype(cdt)
        wp_h = wp_ref[...].reshape(H, dh, -1)                        # free split
        out = xq_ref[0].astype(jnp.float32) + bp_ref[...]           # residual + bias
        # Per-head 2-D projections: avoids the old (P, N).T lane transpose and the
        # 'h q d -> q (h d)' relayout while staying lowering-safe.  H is static.
        for h in range(H):
            out = out + jnp.dot(o[h], wp_h[h], preferred_element_type=jnp.float32)
        o_ref[0] = out.astype(o_ref.dtype)


def mha_block(x, p, *, num_heads, head_dim, q_tile=None, kv_tile=None):
    B, N, D = x.shape
    H, dh = num_heads, head_dim
    P = H * dh
    tq = q_tile if q_tile is not None else _pick_tile(N, 256)
    tk = kv_tile if kv_tile is not None else _pick_tile(N, 256)
    if tq != N and tq % 8 != 0:
        tq = N
    if tk != N and tk % 8 != 0:
        tk = N
    assert N % tq == 0 and N % tk == 0

    cdt = p["wq_t"].dtype
    cbytes = jnp.dtype(cdt).itemsize
    xbytes = jnp.dtype(x.dtype).itemsize

    flops = 2 * B * N * D * 3 * P + 4 * B * N * N * P + 2 * B * N * P * D
    transcendentals = B * H * N * N + 2 * B * N
    bytes_accessed = xbytes * 2 * B * N * D + cbytes * 4 * P * D + 4 * 3 * D

    # Working-set estimate -> explicit vmem limit (review item).
    vmem = (4 * P * D * cbytes + 3 * D * 4                   # weights (single-buffered)
            + 2 * (2 * tq + tk) * D * xbytes                 # x / out blocks (x2 buffers)
            + H * dh * tq * cbytes + H * tq * (dh + 2) * 4   # scratch
            + (2 * H * tq * tk + 2 * P * tk) * 4)            # in-kernel temporaries
    vmem_limit = int(min(100 << 20, max(32 << 20, 2 * vmem)))

    kernel = functools.partial(_mha_kernel, num_heads=H, head_dim=dh)
    return pl.pallas_call(
        kernel,
        out_shape=jax.ShapeDtypeStruct((B, N, D), x.dtype),
        grid=(B, N // tq, N // tk),
        in_specs=[
            pl.BlockSpec((1, tq, D), lambda b, i, j: (b, i, 0)),   # x (query rows)
            pl.BlockSpec((1, tk, D), lambda b, i, j: (b, j, 0)),   # x (kv rows)
            _wspec((1, D)), _wspec((1, D)),                        # ln1 gamma / beta
            _wspec((P, D)), _wspec((P, D)), _wspec((P, D)),        # wq_t / wk_t / wv_t
            _wspec((P, D)), _wspec((1, D)),                        # wp / bp
        ],
        out_specs=pl.BlockSpec((1, tq, D), lambda b, i, j: (b, i, 0)),
        scratch_shapes=[
            pltpu.VMEM((H, dh, tq), cdt),          # cached q tile (transposed)
            pltpu.VMEM((H, tq, 1), jnp.float32),   # running max
            pltpu.VMEM((H, tq, 1), jnp.float32),   # running sum
            pltpu.VMEM((H, tq, dh), jnp.float32),  # output accumulator
        ],
        compiler_params=pltpu.CompilerParams(
            dimension_semantics=("parallel", "parallel", "arbitrary"),
            vmem_limit_bytes=vmem_limit),
        cost_estimate=pl.CostEstimate(flops=flops,
                                      transcendentals=transcendentals,
                                      bytes_accessed=bytes_accessed),
    )(x, x, p["ln1_g"], p["ln1_b"],
      p["wq_t"], p["wk_t"], p["wv_t"], p["wp"], p["bp"])


# ------------------------------- MLP kernel ----------------------------------

def _mlp_kernel(x_ref, ln2g_ref, ln2b_ref, w1_ref, b1_ref, w2_ref, b2_ref,
                o_ref, xn_scr, acc_scr):
    """Fused LayerNorm + GELU MLP + residual; the hidden (Dm) dim is the
    innermost ('arbitrary') grid axis so w1/w2 stream in tiles."""
    j = pl.program_id(2)
    cdt = w1_ref.dtype

    @pl.when(j == 0)
    def _():
        x = x_ref[0].astype(jnp.float32)
        xn_scr[...] = _layernorm(x, ln2g_ref[...], ln2b_ref[...]).astype(cdt)
        acc_scr[...] = x + b2_ref[...]          # residual + output bias (added once)

    h = jnp.dot(xn_scr[...], w1_ref[...],
                preferred_element_type=jnp.float32) + b1_ref[...]
    h = jax.nn.gelu(h, approximate=False)       # exact-erf GELU (torch nn.GELU default)
    acc_scr[...] += jnp.dot(h.astype(cdt), w2_ref[...],
                            preferred_element_type=jnp.float32)

    @pl.when(j == pl.num_programs(2) - 1)
    def _():
        o_ref[0] = acc_scr[...].astype(o_ref.dtype)


def mlp_block(x, p, *, seq_tile=None, dm_tile=None):
    B, N, D = x.shape
    Dm = p["w1"].shape[1]
    tn = seq_tile if seq_tile is not None else _pick_tile(N, 256)
    tdm = dm_tile if dm_tile is not None else _pick_tile(Dm, 512)
    if tn != N and tn % 8 != 0:
        tn = N
    if tdm != Dm and tdm % 128 != 0:            # keep w1/b1 blocks lane-aligned
        tdm = Dm
    assert N % tn == 0 and Dm % tdm == 0

    cdt = p["w1"].dtype
    cbytes = jnp.dtype(cdt).itemsize
    xbytes = jnp.dtype(x.dtype).itemsize

    flops = 4 * B * N * D * Dm
    transcendentals = B * N * Dm + B * N
    bytes_accessed = xbytes * 2 * B * N * D + cbytes * 2 * D * Dm + 4 * (3 * D + Dm)

    vmem = (2 * 2 * D * tdm * cbytes + (3 * D + 2 * tdm) * 4  # streamed weights + params
            + 2 * 2 * tn * D * xbytes                         # x / out blocks
            + tn * D * (cbytes + 4)                           # scratch
            + tn * tdm * 4)                                   # hidden temporary
    vmem_limit = int(min(100 << 20, max(32 << 20, 2 * vmem)))

    return pl.pallas_call(
        _mlp_kernel,
        out_shape=jax.ShapeDtypeStruct((B, N, D), x.dtype),
        grid=(B, N // tn, Dm // tdm),
        in_specs=[
            pl.BlockSpec((1, tn, D), lambda b, i, j: (b, i, 0)),   # x
            _wspec((1, D)), _wspec((1, D)),                        # ln2 gamma / beta
            pl.BlockSpec((D, tdm), lambda b, i, j: (0, j)),        # w1 tile (streamed)
            pl.BlockSpec((1, tdm), lambda b, i, j: (0, j)),        # b1 tile
            pl.BlockSpec((tdm, D), lambda b, i, j: (j, 0)),        # w2 tile (streamed)
            _wspec((1, D)),                                        # b2
        ],
        out_specs=pl.BlockSpec((1, tn, D), lambda b, i, j: (b, i, 0)),
        scratch_shapes=[pltpu.VMEM((tn, D), cdt),          # cached LN2 output
                        pltpu.VMEM((tn, D), jnp.float32)], # f32 accumulator
        compiler_params=pltpu.CompilerParams(
            dimension_semantics=("parallel", "parallel", "arbitrary"),
            vmem_limit_bytes=vmem_limit),
        cost_estimate=pl.CostEstimate(flops=flops,
                                      transcendentals=transcendentals,
                                      bytes_accessed=bytes_accessed),
    )(x, p["ln2_g"], p["ln2_b"], p["w1"], p["b1"], p["w2"], p["b2"])


# ------------------------- one-time parameter prep ----------------------------

def prepare_params(raw_params, *, num_heads, head_dim, compute_dtype=jnp.bfloat16):
    """Layout + dtype prep paid once at load time (not per layer per call):
    wqkv transposed/split, 1/sqrt(dh) folded into wq, weights cast to bf16."""
    P = num_heads * head_dim
    scale = head_dim ** (-0.5)
    prepped = []
    for blk in raw_params:
        D = blk["wqkv"].shape[0]
        Dm = blk["w1"].shape[1]
        wqkv_t = jnp.asarray(blk["wqkv"]).T                       # (3P, D)
        prepped.append(dict(
            ln1_g=blk["ln1_g"].reshape(1, D).astype(jnp.float32),
            ln1_b=blk["ln1_b"].reshape(1, D).astype(jnp.float32),
            wq_t=(wqkv_t[:P] * scale).astype(compute_dtype),      # scale folded into q
            wk_t=wqkv_t[P:2 * P].astype(compute_dtype),
            wv_t=wqkv_t[2 * P:].astype(compute_dtype),
            wp=blk["wp"].astype(compute_dtype),                   # (P, D)
            bp=blk["bp"].reshape(1, D).astype(jnp.float32),
            ln2_g=blk["ln2_g"].reshape(1, D).astype(jnp.float32),
            ln2_b=blk["ln2_b"].reshape(1, D).astype(jnp.float32),
            w1=blk["w1"].astype(compute_dtype),                   # (D, Dm)
            b1=blk["b1"].reshape(1, Dm).astype(jnp.float32),
            w2=blk["w2"].astype(compute_dtype),                   # (Dm, D)
            b2=blk["b2"].reshape(1, D).astype(jnp.float32),
        ))
    return prepped


def megatron_forward(x, prepped_params, *, num_heads, head_dim,
                     q_tile=None, kv_tile=None, seq_tile=None, dm_tile=None):
    """Megatron.forward with mask=None, extract_attention=False (inference)."""
    for p in prepped_params:
        x = mha_block(x, p, num_heads=num_heads, head_dim=head_dim,
                      q_tile=q_tile, kv_tile=kv_tile)
        x = mlp_block(x, p, seq_tile=seq_tile, dm_tile=dm_tile)
    return x


# ----------------------------- reference (pure JAX) ---------------------------

def megatron_reference(x, raw_params, *, num_heads, head_dim):
    scale = head_dim ** (-0.5)

    def ln(v, g, b):
        mu = jnp.mean(v, -1, keepdims=True)
        var = jnp.mean((v - mu) ** 2, -1, keepdims=True)
        return (v - mu) / jnp.sqrt(var + 1e-5) * g + b

    for blk in raw_params:
        B, N, D = x.shape
        P = num_heads * head_dim
        xn = ln(x, blk["ln1_g"], blk["ln1_b"])
        qkv = xn @ blk["wqkv"]                                   # (B, N, 3P)
        q, k, v = qkv[..., :P], qkv[..., P:2 * P], qkv[..., 2 * P:]
        q = q.reshape(B, N, num_heads, head_dim).transpose(0, 2, 1, 3)
        k = k.reshape(B, N, num_heads, head_dim).transpose(0, 2, 1, 3)
        v = v.reshape(B, N, num_heads, head_dim).transpose(0, 2, 1, 3)
        s = jnp.einsum("bhnd,bhmd->bhnm", q, k) * scale
        a = jax.nn.softmax(s, axis=-1)
        o = jnp.einsum("bhnm,bhmd->bhnd", a, v).transpose(0, 2, 1, 3).reshape(B, N, P)
        x = o @ blk["wp"] + blk["bp"] + x
        xn = ln(x, blk["ln2_g"], blk["ln2_b"])
        h = jax.nn.gelu(xn @ blk["w1"] + blk["b1"], approximate=False)
        x = h @ blk["w2"] + blk["b2"] + x
    return x


# ----------------------------------- main -------------------------------------

if __name__ == "__main__":
    # Small shapes consistent with the module; N/tiles chosen so the multi-step
    # online-softmax and multi-q-tile paths are actually exercised
    # (attention grid = (2, 2, 2), MLP grid = (2, 2, 1)).
    B, N = 2, 16
    modelDim = 32
    numHeads = 4
    attnHeadDim = 8
    mlpDim = 64
    blocks = 2
    P = numHeads * attnHeadDim

    key = jax.random.PRNGKey(0)
    key, xk = jax.random.split(key)
    x = jax.random.normal(xk, (B, N, modelDim), dtype=jnp.float32)

    raw_params = []
    for _ in range(blocks):
        key, k1, k2, k3, k4, k5, k6, k7, k8, k9 = jax.random.split(key, 10)
        raw_params.append(dict(
            ln1_g=1.0 + 0.1 * jax.random.normal(k5, (modelDim,), jnp.float32),
            ln1_b=0.1 * jax.random.normal(k6, (modelDim,), jnp.float32),
            wqkv=0.05 * jax.random.normal(k1, (modelDim, 3 * P), jnp.float32),
            wp=0.05 * jax.random.normal(k2, (P, modelDim), jnp.float32),
            bp=0.01 * jax.random.normal(k7, (modelDim,), jnp.float32),
            ln2_g=1.0 + 0.1 * jax.random.normal(k8, (modelDim,), jnp.float32),
            ln2_b=0.1 * jax.random.normal(k9, (modelDim,), jnp.float32),
            w1=0.05 * jax.random.normal(k3, (modelDim, mlpDim), jnp.float32),
            b1=0.01 * jnp.ones((mlpDim,), jnp.float32),
            w2=0.05 * jax.random.normal(k4, (mlpDim, modelDim), jnp.float32),
            b2=0.01 * jnp.ones((modelDim,), jnp.float32),
        ))

    params = prepare_params(raw_params, num_heads=numHeads, head_dim=attnHeadDim,
                            compute_dtype=jnp.bfloat16)

    out = megatron_forward(x, params, num_heads=numHeads, head_dim=attnHeadDim,
                           q_tile=8, kv_tile=8, seq_tile=8)
    out = jax.block_until_ready(out)

    ref = megatron_reference(x, raw_params, num_heads=numHeads, head_dim=attnHeadDim)
    assert out.shape == (B, N, modelDim)
    # bf16 weights / matmul operands (f32 accumulation) vs. an f32 reference:
    # errors are a few 1e-3; tolerance leaves margin.
    assert jnp.allclose(out, ref, rtol=2e-2, atol=2e-2), \
        "Pallas output mismatch vs reference"

    print("KERNEL_OK")
</pallas_src>

<mosaic_0001>
module attributes {stable_mosaic.version = 11 : i64} {
  func.func @_mha_kernel(%arg0: i32, %arg1: i32, %arg2: i32, %arg3: memref<1x8x32xf32, #tpu.memory_space<vmem>>, %arg4: memref<1x8x32xf32, #tpu.memory_space<vmem>>, %arg5: memref<1x32xf32, #tpu.memory_space<vmem>>, %arg6: memref<1x32xf32, #tpu.memory_space<vmem>>, %arg7: memref<32x32xbf16, #tpu.memory_space<vmem>>, %arg8: memref<32x32xbf16, #tpu.memory_space<vmem>>, %arg9: memref<32x32xbf16, #tpu.memory_space<vmem>>, %arg10: memref<32x32xbf16, #tpu.memory_space<vmem>>, %arg11: memref<1x32xf32, #tpu.memory_space<vmem>>, %arg12: memref<1x8x32xf32, #tpu.memory_space<vmem>>, %arg13: memref<4x8x8xbf16, #tpu.memory_space<vmem>>, %arg14: memref<4x8x1xf32, #tpu.memory_space<vmem>>, %arg15: memref<4x8x1xf32, #tpu.memory_space<vmem>>, %arg16: memref<4x8x8xf32, #tpu.memory_space<vmem>>) attributes {dimension_semantics = [#tpu.dimension_semantics<parallel>, #tpu.dimension_semantics<parallel>, #tpu.dimension_semantics<arbitrary>], iteration_bounds = array<i64: 2, 2, 2>, scalar_prefetch = 0 : i64, scratch_operands = 4 : i64, tpu.core_type = #tpu.core_type<tc>, window_params = [{transform_indices = @transform_0, window_bounds = array<i64: 1, 8, 32>}, {transform_indices = @transform_1, window_bounds = array<i64: 1, 8, 32>}, {pipeline_mode = #tpu.pipeline_mode<synchronous>, transform_indices = @transform_2, window_bounds = array<i64: 1, 32>}, {pipeline_mode = #tpu.pipeline_mode<synchronous>, transform_indices = @transform_3, window_bounds = array<i64: 1, 32>}, {pipeline_mode = #tpu.pipeline_mode<synchronous>, transform_indices = @transform_4, window_bounds = array<i64: 32, 32>}, {pipeline_mode = #tpu.pipeline_mode<synchronous>, transform_indices = @transform_5, window_bounds = array<i64: 32, 32>}, {pipeline_mode = #tpu.pipeline_mode<synchronous>, transform_indices = @transform_6, window_bounds = array<i64: 32, 32>}, {pipeline_mode = #tpu.pipeline_mode<synchronous>, transform_indices = @transform_7, window_bounds = array<i64: 32, 32>}, {pipeline_mode = #tpu.pipeline_mode<synchronous>, transform_indices = @transform_8, window_bounds = array<i64: 1, 32>}, {transform_indices = @transform_9, window_bounds = array<i64: 1, 8, 32>}]} {
    %c0_i32 = arith.constant 0 : i32
    %0 = arith.cmpi eq, %arg2, %c0_i32 : i32
    %1 = arith.extui %0 : i1 to i32
    %c0_i32_0 = arith.constant 0 : i32
    %2 = arith.cmpi ne, %1, %c0_i32_0 : i32
    scf.if %2 {
      %c0_43 = arith.constant 0 : index
      %c0_44 = arith.constant 0 : index
      %c0_45 = arith.constant 0 : index
      %64 = vector.load %arg3[%c0_43, %c0_44, %c0_45] : memref<1x8x32xf32, #tpu.memory_space<vmem>>, vector<1x8x32xf32>
      %65 = vector.shape_cast %64 : vector<1x8x32xf32> to vector<8x32xf32>
      %c0_46 = arith.constant 0 : index
      %c0_47 = arith.constant 0 : index
      %66 = vector.load %arg5[%c0_46, %c0_47] : memref<1x32xf32, #tpu.memory_space<vmem>>, vector<1x32xf32>
      %c0_48 = arith.constant 0 : index
      %c0_49 = arith.constant 0 : index
      %67 = vector.load %arg6[%c0_48, %c0_49] : memref<1x32xf32, #tpu.memory_space<vmem>>, vector<1x32xf32>
      %cst_50 = arith.constant dense<0.000000e+00> : vector<8xf32>
      %68 = vector.multi_reduction <add>, %65, %cst_50 [1] : vector<8x32xf32> to vector<8xf32>
      %69 = vector.shape_cast %68 : vector<8xf32> to vector<8x1xf32>
      %cst_51 = arith.constant 3.200000e+01 : f32
      %70 = vector.broadcast %cst_51 : f32 to vector<8x1xf32>
      %71 = arith.divf %69, %70 : vector<8x1xf32>
      %72 = vector.broadcast %71 : vector<8x1xf32> to vector<8x32xf32>
      %73 = arith.subf %65, %72 : vector<8x32xf32>
      %74 = arith.mulf %73, %73 : vector<8x32xf32>
      %cst_52 = arith.constant dense<0.000000e+00> : vector<8xf32>
      %75 = vector.multi_reduction <add>, %74, %cst_52 [1] : vector<8x32xf32> to vector<8xf32>
      %76 = vector.shape_cast %75 : vector<8xf32> to vector<8x1xf32>
      %cst_53 = arith.constant 3.200000e+01 : f32
      %77 = vector.broadcast %cst_53 : f32 to vector<8x1xf32>
      %78 = arith.divf %76, %77 : vector<8x1xf32>
      %cst_54 = arith.constant 9.99999974E-6 : f32
      %79 = vector.broadcast %cst_54 : f32 to vector<8x1xf32>
      %80 = arith.addf %78, %79 : vector<8x1xf32>
      %81 = math.rsqrt %80 : vector<8x1xf32>
      %82 = vector.broadcast %81 : vector<8x1xf32> to vector<8x32xf32>
      %83 = arith.mulf %73, %82 : vector<8x32xf32>
      %84 = vector.broadcast %66 : vector<1x32xf32> to vector<8x32xf32>
      %85 = arith.mulf %83, %84 : vector<8x32xf32>
      %86 = vector.broadcast %67 : vector<1x32xf32> to vector<8x32xf32>
      %87 = arith.addf %85, %86 : vector<8x32xf32>
      %c0_55 = arith.constant 0 : index
      %c0_56 = arith.constant 0 : index
      %88 = vector.load %arg7[%c0_55, %c0_56] : memref<32x32xbf16, #tpu.memory_space<vmem>>, vector<32x32xbf16>
      %89 = arith.truncf %87 : vector<8x32xf32> to vector<8x32xbf16>
      %cst_57 = arith.constant dense<0.000000e+00> : vector<32x8xf32>
      %90 = tpu.matmul %88, %89, %cst_57 {dimension_numbers = #tpu.dot_dimension_numbers<[1], [1], [0], [0], [0, 0, 1, 0], [], []>} : vector<32x32xbf16>, vector<8x32xbf16>, vector<32x8xf32> -> vector<32x8xf32>
      %91 = vector.shape_cast %90 : vector<32x8xf32> to vector<4x8x8xf32>
      %92 = arith.truncf %91 : vector<4x8x8xf32> to vector<4x8x8xbf16>
      %c0_58 = arith.constant 0 : index
      %c0_59 = arith.constant 0 : index
      %c0_60 = arith.constant 0 : index
      %93 = vector.load %arg13[%c0_58, %c0_59, %c0_60] : memref<4x8x8xbf16, #tpu.memory_space<vmem>>, vector<4x8x8xbf16>
      tpu.vector_store %arg13[%c0_58, %c0_59, %c0_60], %92 {strides = array<i32>} : memref<4x8x8xbf16, #tpu.memory_space<vmem>>, vector<4x8x8xbf16>,
      %cst_61 = arith.constant 0xFF800000 : f32
      %94 = vector.broadcast %cst_61 : f32 to vector<4x8x1xf32>
      %c0_62 = arith.constant 0 : index
      %c0_63 = arith.constant 0 : index
      %c0_64 = arith.constant 0 : index
      %95 = vector.load %arg14[%c0_62, %c0_63, %c0_64] : memref<4x8x1xf32, #tpu.memory_space<vmem>>, vector<4x8x1xf32>
      tpu.vector_store %arg14[%c0_62, %c0_63, %c0_64], %94 {strides = array<i32>} : memref<4x8x1xf32, #tpu.memory_space<vmem>>, vector<4x8x1xf32>,
      %cst_65 = arith.constant 0.000000e+00 : f32
      %96 = vector.broadcast %cst_65 : f32 to vector<4x8x1xf32>
      %c0_66 = arith.constant 0 : index
      %c0_67 = arith.constant 0 : index
      %c0_68 = arith.constant 0 : index
      %97 = vector.load %arg15[%c0_66, %c0_67, %c0_68] : memref<4x8x1xf32, #tpu.memory_space<vmem>>, vector<4x8x1xf32>
      tpu.vector_store %arg15[%c0_66, %c0_67, %c0_68], %96 {strides = array<i32>} : memref<4x8x1xf32, #tpu.memory_space<vmem>>, vector<4x8x1xf32>,
      %cst_69 = arith.constant 0.000000e+00 : f32
      %98 = vector.broadcast %cst_69 : f32 to vector<4x8x8xf32>
      %c0_70 = arith.constant 0 : index
      %c0_71 = arith.constant 0 : index
      %c0_72 = arith.constant 0 : index
      %99 = vector.load %arg16[%c0_70, %c0_71, %c0_72] : memref<4x8x8xf32, #tpu.memory_space<vmem>>, vector<4x8x8xf32>
      tpu.vector_store %arg16[%c0_70, %c0_71, %c0_72], %98 {strides = array<i32>} : memref<4x8x8xf32, #tpu.memory_space<vmem>>, vector<4x8x8xf32>,
    } else {
    }
    %c0 = arith.constant 0 : index
    %c0_1 = arith.constant 0 : index
    %c0_2 = arith.constant 0 : index
    %3 = vector.load %arg4[%c0, %c0_1, %c0_2] : memref<1x8x32xf32, #tpu.memory_space<vmem>>, vector<1x8x32xf32>
    %4 = vector.shape_cast %3 : vector<1x8x32xf32> to vector<8x32xf32>
    %c0_3 = arith.constant 0 : index
    %c0_4 = arith.constant 0 : index
    %5 = vector.load %arg5[%c0_3, %c0_4] : memref<1x32xf32, #tpu.memory_space<vmem>>, vector<1x32xf32>
    %c0_5 = arith.constant 0 : index
    %c0_6 = arith.constant 0 : index
    %6 = vector.load %arg6[%c0_5, %c0_6] : memref<1x32xf32, #tpu.memory_space<vmem>>, vector<1x32xf32>
    %cst = arith.constant dense<0.000000e+00> : vector<8xf32>
    %7 = vector.multi_reduction <add>, %4, %cst [1] : vector<8x32xf32> to vector<8xf32>
    %8 = vector.shape_cast %7 : vector<8xf32> to vector<8x1xf32>
    %cst_7 = arith.constant 3.200000e+01 : f32
    %9 = vector.broadcast %cst_7 : f32 to vector<8x1xf32>
    %10 = arith.divf %8, %9 : vector<8x1xf32>
    %11 = vector.broadcast %10 : vector<8x1xf32> to vector<8x32xf32>
    %12 = arith.subf %4, %11 : vector<8x32xf32>
    %13 = arith.mulf %12, %12 : vector<8x32xf32>
    %cst_8 = arith.constant dense<0.000000e+00> : vector<8xf32>
    %14 = vector.multi_reduction <add>, %13, %cst_8 [1] : vector<8x32xf32> to vector<8xf32>
    %15 = vector.shape_cast %14 : vector<8xf32> to vector<8x1xf32>
    %cst_9 = arith.constant 3.200000e+01 : f32
    %16 = vector.broadcast %cst_9 : f32 to vector<8x1xf32>
    %17 = arith.divf %15, %16 : vector<8x1xf32>
    %cst_10 = arith.constant 9.99999974E-6 : f32
    %18 = vector.broadcast %cst_10 : f32 to vector<8x1xf32>
    %19 = arith.addf %17, %18 : vector<8x1xf32>
    %20 = math.rsqrt %19 : vector<8x1xf32>
    %21 = vector.broadcast %20 : vector<8x1xf32> to vector<8x32xf32>
    %22 = arith.mulf %12, %21 : vector<8x32xf32>
    %23 = vector.broadcast %5 : vector<1x32xf32> to vector<8x32xf32>
    %24 = arith.mulf %22, %23 : vector<8x32xf32>
    %25 = vector.broadcast %6 : vector<1x32xf32> to vector<8x32xf32>
    %26 = arith.addf %24, %25 : vector<8x32xf32>
    %27 = arith.truncf %26 : vector<8x32xf32> to vector<8x32xbf16>
    %c0_11 = arith.constant 0 : index
    %c0_12 = arith.constant 0 : index
    %28 = vector.load %arg8[%c0_11, %c0_12] : memref<32x32xbf16, #tpu.memory_space<vmem>>, vector<32x32xbf16>
    %cst_13 = arith.constant dense<0.000000e+00> : vector<32x8xf32>
    %29 = tpu.matmul %28, %27, %cst_13 {dimension_numbers = #tpu.dot_dimension_numbers<[1], [1], [0], [0], [0, 0, 1, 0], [], []>} : vector<32x32xbf16>, vector<8x32xbf16>, vector<32x8xf32> -> vector<32x8xf32>
    %30 = vector.shape_cast %29 : vector<32x8xf32> to vector<4x8x8xf32>
    %31 = arith.truncf %30 : vector<4x8x8xf32> to vector<4x8x8xbf16>
    %c0_14 = arith.constant 0 : index
    %c0_15 = arith.constant 0 : index
    %32 = vector.load %arg9[%c0_14, %c0_15] : memref<32x32xbf16, #tpu.memory_space<vmem>>, vector<32x32xbf16>
    %cst_16 = arith.constant dense<0.000000e+00> : vector<32x8xf32>
    %33 = tpu.matmul %32, %27, %cst_16 {dimension_numbers = #tpu.dot_dimension_numbers<[1], [1], [0], [0], [0, 0, 1, 0], [], []>} : vector<32x32xbf16>, vector<8x32xbf16>, vector<32x8xf32> -> vector<32x8xf32>
    %34 = vector.shape_cast %33 : vector<32x8xf32> to vector<4x8x8xf32>
    %35 = arith.truncf %34 : vector<4x8x8xf32> to vector<4x8x8xbf16>
    %c0_17 = arith.constant 0 : index
    %c0_18 = arith.constant 0 : index
    %c0_19 = arith.constant 0 : index
    %36 = vector.load %arg13[%c0_17, %c0_18, %c0_19] : memref<4x8x8xbf16, #tpu.memory_space<vmem>>, vector<4x8x8xbf16>
    %cst_20 = arith.constant dense<0.000000e+00> : vector<4x8x8xf32>
    %37 = tpu.matmul %36, %31, %cst_20 {dimension_numbers = #tpu.dot_dimension_numbers<[1], [1], [2], [2], [0, 0, 0, 2, 1, 2], [0], [0]>} : vector<4x8x8xbf16>, vector<4x8x8xbf16>, vector<4x8x8xf32> -> vector<4x8x8xf32>
    %c0_21 = arith.constant 0 : index
    %c0_22 = arith.constant 0 : index
    %c0_23 = arith.constant 0 : index
    %38 = vector.load %arg14[%c0_21, %c0_22, %c0_23] : memref<4x8x1xf32, #tpu.memory_space<vmem>>, vector<4x8x1xf32>
    %cst_24 = arith.constant dense<0xFF800000> : vector<4x8xf32>
    %39 = vector.multi_reduction <maximumf>, %37, %cst_24 [2] : vector<4x8x8xf32> to vector<4x8xf32>
    %40 = vector.shape_cast %39 : vector<4x8xf32> to vector<4x8x1xf32>
    %41 = arith.maximumf %38, %40 : vector<4x8x1xf32>
    %42 = arith.subf %38, %41 : vector<4x8x1xf32>
    %43 = math.exp %42 : vector<4x8x1xf32>
    %44 = vector.broadcast %41 : vector<4x8x1xf32> to vector<4x8x8xf32>
    %45 = arith.subf %37, %44 : vector<4x8x8xf32>
    %46 = math.exp %45 : vector<4x8x8xf32>
    %c0_25 = arith.constant 0 : index
    %c0_26 = arith.constant 0 : index
    %c0_27 = arith.constant 0 : index
    %47 = vector.load %arg15[%c0_25, %c0_26, %c0_27] : memref<4x8x1xf32, #tpu.memory_space<vmem>>, vector<4x8x1xf32>
    %48 = arith.mulf %43, %47 : vector<4x8x1xf32>
    %cst_28 = arith.constant dense<0.000000e+00> : vector<4x8xf32>
    %49 = vector.multi_reduction <add>, %46, %cst_28 [2] : vector<4x8x8xf32> to vector<4x8xf32>
    %50 = vector.shape_cast %49 : vector<4x8xf32> to vector<4x8x1xf32>
    %51 = arith.addf %48, %50 : vector<4x8x1xf32>
    %c0_29 = arith.constant 0 : index
    %c0_30 = arith.constant 0 : index
    %c0_31 = arith.constant 0 : index
    %52 = vector.load %arg15[%c0_29, %c0_30, %c0_31] : memref<4x8x1xf32, #tpu.memory_space<vmem>>, vector<4x8x1xf32>
    tpu.vector_store %arg15[%c0_29, %c0_30, %c0_31], %51 {strides = array<i32>} : memref<4x8x1xf32, #tpu.memory_space<vmem>>, vector<4x8x1xf32>,
    %53 = arith.truncf %46 : vector<4x8x8xf32> to vector<4x8x8xbf16>
    %cst_32 = arith.constant dense<0.000000e+00> : vector<4x8x8xf32>
    %54 = tpu.matmul %53, %35, %cst_32 {dimension_numbers = #tpu.dot_dimension_numbers<[2], [2], [1], [1], [0, 0, 0, 1, 1, 1], [0], [0]>} : vector<4x8x8xbf16>, vector<4x8x8xbf16>, vector<4x8x8xf32> -> vector<4x8x8xf32>
    %c0_33 = arith.constant 0 : index
    %c0_34 = arith.constant 0 : index
    %c0_35 = arith.constant 0 : index
    %55 = vector.load %arg16[%c0_33, %c0_34, %c0_35] : memref<4x8x8xf32, #tpu.memory_space<vmem>>, vector<4x8x8xf32>
    %56 = vector.broadcast %43 : vector<4x8x1xf32> to vector<4x8x8xf32>
    %57 = arith.mulf %56, %55 : vector<4x8x8xf32>
    %58 = arith.addf %57, %54 : vector<4x8x8xf32>
    %c0_36 = arith.constant 0 : index
    %c0_37 = arith.constant 0 : index
    %c0_38 = arith.constant 0 : index
    %59 = vector.load %arg16[%c0_36, %c0_37, %c0_38] : memref<4x8x8xf32, #tpu.memory_space<vmem>>, vector<4x8x8xf32>
    tpu.vector_store %arg16[%c0_36, %c0_37, %c0_38], %58 {strides = array<i32>} : memref<4x8x8xf32, #tpu.memory_space<vmem>>, vector<4x8x8xf32>,
    %c0_39 = arith.constant 0 : index
    %c0_40 = arith.constant 0 : index
    %c0_41 = arith.constant 0 : index
    %60 = vector.load %arg14[%c0_39, %c0_40, %c0_41] : memref<4x8x1xf32, #tpu.memory_space<vmem>>, vector<4x8x1xf32>
    tpu.vector_store %arg14[%c0_39, %c0_40, %c0_41], %41 {strides = array<i32>} : memref<4x8x1xf32, #tpu.memory_space<vmem>>, vector<4x8x1xf32>,
    %c1_i32 = arith.constant 1 : i32
    %61 = arith.cmpi eq, %arg2, %c1_i32 : i32
    %62 = arith.extui %61 : i1 to i32
    %c0_i32_42 = arith.constant 0 : i32
    %63 = arith.cmpi ne, %62, %c0_i32_42 : i32
    scf.if %63 {
      %c0_43 = arith.constant 0 : index
      %c0_44 = arith.constant 0 : index
      %c0_45 = arith.constant 0 : index
      %64 = vector.load %arg16[%c0_43, %c0_44, %c0_45] : memref<4x8x8xf32, #tpu.memory_space<vmem>>, vector<4x8x8xf32>
      %c0_46 = arith.constant 0 : index
      %c0_47 = arith.constant 0 : index
      %c0_48 = arith.constant 0 : index
      %65 = vector.load %arg15[%c0_46, %c0_47, %c0_48] : memref<4x8x1xf32, #tpu.memory_space<vmem>>, vector<4x8x1xf32>
      %66 = tpu.reciprocal %65 : vector<4x8x1xf32> -> vector<4x8x1xf32>
      %67 = vector.broadcast %66 : vector<4x8x1xf32> to vector<4x8x8xf32>
      %68 = arith.mulf %64, %67 : vector<4x8x8xf32>
      %69 = arith.truncf %68 : vector<4x8x8xf32> to vector<4x8x8xbf16>
      %c0_49 = arith.constant 0 : index
      %c0_50 = arith.constant 0 : index
      %70 = vector.load %arg10[%c0_49, %c0_50] : memref<32x32xbf16, #tpu.memory_space<vmem>>, vector<32x32xbf16>
      %71 = vector.shape_cast %70 : vector<32x32xbf16> to vector<4x8x32xbf16>
      %c0_51 = arith.constant 0 : index
      %c0_52 = arith.constant 0 : index
      %c0_53 = arith.constant 0 : index
      %72 = vector.load %arg3[%c0_51, %c0_52, %c0_53] : memref<1x8x32xf32, #tpu.memory_space<vmem>>, vector<1x8x32xf32>
      %73 = vector.shape_cast %72 : vector<1x8x32xf32> to vector<8x32xf32>
      %c0_54 = arith.constant 0 : index
      %c0_55 = arith.constant 0 : index
      %74 = vector.load %arg11[%c0_54, %c0_55] : memref<1x32xf32, #tpu.memory_space<vmem>>, vector<1x32xf32>
      %75 = vector.broadcast %74 : vector<1x32xf32> to vector<8x32xf32>
      %76 = arith.addf %73, %75 : vector<8x32xf32>
      %77 = vector.extract_strided_slice %69 {offsets = [0, 0, 0], sizes = [1, 8, 8], strides = [1, 1, 1]} : vector<4x8x8xbf16> to vector<1x8x8xbf16>
      %78 = vector.shape_cast %77 : vector<1x8x8xbf16> to vector<8x8xbf16>
      %79 = vector.extract_strided_slice %71 {offsets = [0, 0, 0], sizes = [1, 8, 32], strides = [1, 1, 1]} : vector<4x8x32xbf16> to vector<1x8x32xbf16>
      %80 = vector.shape_cast %79 : vector<1x8x32xbf16> to vector<8x32xbf16>
      %cst_56 = arith.constant dense<0.000000e+00> : vector<8x32xf32>
      %81 = tpu.matmul %78, %80, %cst_56 {dimension_numbers = #tpu.dot_dimension_numbers<[1], [0], [0], [1], [0, 0, 1, 1], [], []>} : vector<8x8xbf16>, vector<8x32xbf16>, vector<8x32xf32> -> vector<8x32xf32>
      %82 = arith.addf %76, %81 : vector<8x32xf32>
      %83 = vector.extract_strided_slice %69 {offsets = [1, 0, 0], sizes = [1, 8, 8], strides = [1, 1, 1]} : vector<4x8x8xbf16> to vector<1x8x8xbf16>
      %84 = vector.shape_cast %83 : vector<1x8x8xbf16> to vector<8x8xbf16>
      %85 = vector.extract_strided_slice %71 {offsets = [1, 0, 0], sizes = [1, 8, 32], strides = [1, 1, 1]} : vector<4x8x32xbf16> to vector<1x8x32xbf16>
      %86 = vector.shape_cast %85 : vector<1x8x32xbf16> to vector<8x32xbf16>
      %cst_57 = arith.constant dense<0.000000e+00> : vector<8x32xf32>
      %87 = tpu.matmul %84, %86, %cst_57 {dimension_numbers = #tpu.dot_dimension_numbers<[1], [0], [0], [1], [0, 0, 1, 1], [], []>} : vector<8x8xbf16>, vector<8x32xbf16>, vector<8x32xf32> -> vector<8x32xf32>
      %88 = arith.addf %82, %87 : vector<8x32xf32>
      %89 = vector.extract_strided_slice %69 {offsets = [2, 0, 0], sizes = [1, 8, 8], strides = [1, 1, 1]} : vector<4x8x8xbf16> to vector<1x8x8xbf16>
      %90 = vector.shape_cast %89 : vector<1x8x8xbf16> to vector<8x8xbf16>
      %91 = vector.extract_strided_slice %71 {offsets = [2, 0, 0], sizes = [1, 8, 32], strides = [1, 1, 1]} : vector<4x8x32xbf16> to vector<1x8x32xbf16>
      %92 = vector.shape_cast %91 : vector<1x8x32xbf16> to vector<8x32xbf16>
      %cst_58 = arith.constant dense<0.000000e+00> : vector<8x32xf32>
      %93 = tpu.matmul %90, %92, %cst_58 {dimension_numbers = #tpu.dot_dimension_numbers<[1], [0], [0], [1], [0, 0, 1, 1], [], []>} : vector<8x8xbf16>, vector<8x32xbf16>, vector<8x32xf32> -> vector<8x32xf32>
      %94 = arith.addf %88, %93 : vector<8x32xf32>
      %95 = vector.extract_strided_slice %69 {offsets = [3, 0, 0], sizes = [1, 8, 8], strides = [1, 1, 1]} : vector<4x8x8xbf16> to vector<1x8x8xbf16>
      %96 = vector.shape_cast %95 : vector<1x8x8xbf16> to vector<8x8xbf16>
      %97 = vector.extract_strided_slice %71 {offsets = [3, 0, 0], sizes = [1, 8, 32], strides = [1, 1, 1]} : vector<4x8x32xbf16> to vector<1x8x32xbf16>
      %98 = vector.shape_cast %97 : vector<1x8x32xbf16> to vector<8x32xbf16>
      %cst_59 = arith.constant dense<0.000000e+00> : vector<8x32xf32>
      %99 = tpu.matmul %96, %98, %cst_59 {dimension_numbers = #tpu.dot_dimension_numbers<[1], [0], [0], [1], [0, 0, 1, 1], [], []>} : vector<8x8xbf16>, vector<8x32xbf16>, vector<8x32xf32> -> vector<8x32xf32>
      %100 = arith.addf %94, %99 : vector<8x32xf32>
      %c0_60 = arith.constant 0 : index
      %c0_61 = arith.constant 0 : index
      %c0_62 = arith.constant 0 : index
      %101 = vector.load %arg12[%c0_60, %c0_61, %c0_62] : memref<1x8x32xf32, #tpu.memory_space<vmem>>, vector<1x8x32xf32>
      %102 = vector.shape_cast %101 : vector<1x8x32xf32> to vector<8x32xf32>
      %103 = vector.shape_cast %100 : vector<8x32xf32> to vector<1x8x32xf32>
      tpu.vector_store %arg12[%c0_60, %c0_61, %c0_62], %103 {strides = array<i32>} : memref<1x8x32xf32, #tpu.memory_space<vmem>>, vector<1x8x32xf32>,
    } else {
    }
    return
  }
  func.func @transform_0(%arg0: i32, %arg1: i32, %arg2: i32) -> (i32, i32, i32) {
    %c0_i32 = arith.constant 0 : i32
    %c0_i32_0 = arith.constant 0 : i32
    return %arg0, %arg1, %c0_i32 : i32, i32, i32
  }
  func.func @transform_1(%arg0: i32, %arg1: i32, %arg2: i32) -> (i32, i32, i32) {
    %c0_i32 = arith.constant 0 : i32
    %c0_i32_0 = arith.constant 0 : i32
    return %arg0, %arg2, %c0_i32 : i32, i32, i32
  }
  func.func @transform_2(%arg0: i32, %arg1: i32, %arg2: i32) -> (i32, i32) {
    %c0_i32 = arith.constant 0 : i32
    %c0_i32_0 = arith.constant 0 : i32
    %c0_i32_1 = arith.constant 0 : i32
    return %c0_i32, %c0_i32_0 : i32, i32
  }
  func.func @transform_3(%arg0: i32, %arg1: i32, %arg2: i32) -> (i32, i32) {
    %c0_i32 = arith.constant 0 : i32
    %c0_i32_0 = arith.constant 0 : i32
    %c0_i32_1 = arith.constant 0 : i32
    return %c0_i32, %c0_i32_0 : i32, i32
  }
  func.func @transform_4(%arg0: i32, %arg1: i32, %arg2: i32) -> (i32, i32) {
    %c0_i32 = arith.constant 0 : i32
    %c0_i32_0 = arith.constant 0 : i32
    %c0_i32_1 = arith.constant 0 : i32
    return %c0_i32, %c0_i32_0 : i32, i32
  }
  func.func @transform_5(%arg0: i32, %arg1: i32, %arg2: i32) -> (i32, i32) {
    %c0_i32 = arith.constant 0 : i32
    %c0_i32_0 = arith.constant 0 : i32
    %c0_i32_1 = arith.constant 0 : i32
    return %c0_i32, %c0_i32_0 : i32, i32
  }
  func.func @transform_6(%arg0: i32, %arg1: i32, %arg2: i32) -> (i32, i32) {
    %c0_i32 = arith.constant 0 : i32
    %c0_i32_0 = arith.constant 0 : i32
    %c0_i32_1 = arith.constant 0 : i32
    return %c0_i32, %c0_i32_0 : i32, i32
  }
  func.func @transform_7(%arg0: i32, %arg1: i32, %arg2: i32) -> (i32, i32) {
    %c0_i32 = arith.constant 0 : i32
    %c0_i32_0 = arith.constant 0 : i32
    %c0_i32_1 = arith.constant 0 : i32
    return %c0_i32, %c0_i32_0 : i32, i32
  }
  func.func @transform_8(%arg0: i32, %arg1: i32, %arg2: i32) -> (i32, i32) {
    %c0_i32 = arith.constant 0 : i32
    %c0_i32_0 = arith.constant 0 : i32
    %c0_i32_1 = arith.constant 0 : i32
    return %c0_i32, %c0_i32_0 : i32, i32
  }
  func.func @transform_9(%arg0: i32, %arg1: i32, %arg2: i32) -> (i32, i32, i32) {
    %c0_i32 = arith.constant 0 : i32
    %c0_i32_0 = arith.constant 0 : i32
    return %arg0, %arg1, %c0_i32 : i32, i32, i32
  }
}

</mosaic_0001>

<bundles_post_ra>
// kernel: tpu_custom_call.1
= control target key start
LH: loop header
LB: loop body
LE: loop exit
PB: predicated region body
PF: predicated region fallthrough
CT: control target
= control target key end

     0   :  { %s3089_s0 = inlined_call_operand.hbm [shape: f32[2,16,32], index: 0, kind: input, shape index: {}]   ;;  %s3090_s1 = inlined_call_operand.hbm [shape: f32[2,16,32], index: 1, kind: input, shape index: {}]   ;;  %s3091_s2 = inlined_call_operand.vmem [shape: f32[1,32], index: 2, kind: input, shape index: {}]   ;;  %s3092_s3 = inlined_call_operand.vmem [shape: f32[1,32], index: 3, kind: input, shape index: {}]   ;;  %s3093_s4 = inlined_call_operand.hbm [shape: bf16[32,32], index: 4, kind: input, shape index: {}]   ;;  %s3094_s5 = inlined_call_operand.vmem [shape: bf16[32,32], index: 5, kind: input, shape index: {}]   ;;  %s3095_s6 = inlined_call_operand.hbm [shape: bf16[32,32], index: 6, kind: input, shape index: {}]   ;;  %s3096_s7 = inlined_call_operand.hbm [shape: bf16[32,32], index: 7, kind: input, shape index: {}]   ;;  %s3097_s8 = inlined_call_operand.vmem [shape: f32[1,32], index: 8, kind: input, shape index: {}]   ;;  %s3098_s9 = inlined_call_operand.hbm [shape: f32[2,16,32], index: 9, kind: output, shape index: {}]  }
   0x1   :  { %3115 = sst [smem:[#allocation30_spill]] %s3090_s1 }
   0x2   :  { %3116 = sst [smem:[#allocation31_spill]] %s3091_s2 }
   0x3   :  { %3117 = sst [smem:[#allocation32_spill]] %s3092_s3 }
   0x4   :  { %3118 = sst [smem:[#allocation33_spill]] %s3093_s4 }
   0x5   :  { %3119 = sst [smem:[#allocation34_spill]] %s3094_s5 }
   0x6   :  { %3120 = sst [smem:[#allocation35_spill]] %s3095_s6 }
   0x7   :  { %3121 = sst [smem:[#allocation36_spill]] %s3096_s7 }
   0x8   :  { %3122 = sst [smem:[#allocation37_spill]] %s3097_s8 }
   0x9   :  { %3123 = sst [smem:[#allocation38_spill]] %s3098_s9 }
   0xa   :  { %14 = vsyncpa [#allocation7], 0 }
   0xb   :  { %16 = vsyncpa [#allocation7 + $0x1], 0 }
   0xc   :  { %17 = vsyncpa [#allocation10], 0 }
   0xd   :  { %19 = vsyncpa [#allocation10 + $0x1], 0 }
   0xe   :  { %20 = vsyncpa [#allocation13], 0 }
   0xf   :  { %21 = vsyncpa [#allocation8], 0 }
  0x10   :  { %23 = vsyncpa [#allocation8 + $0x1], 0  ;;  %s2509_s30 = smov 0   ;;  %s2511_s10 = smov 0  }
  0x11   :  { %s2513_s11 = smov 0   ;;  %s2515_s12 = smov 0  }
  0x12   :  { %s2517_s13 = smov 0   ;;  %s2519_s14 = smov 0  }
  0x13   :  { %s2521_s15 = smov 0   ;;  %s2523_s16 = smov 0  }
  0x14   :  { %s2525_s17 = smov 0   ;;  %s2527_s18 = smov 0  }
  0x15   :  { %s2529_s19 = smov 0   ;;  %s2531_s20 = smov 0  }
  0x16   :  { %s2533_s21 = smov 0  }
  0x17 LB: > { %3124 = sst [smem:[#allocation21_spill]] %s2405_s12  ;;  %s2575_s22 = sadd.s32 4294967295, %s2441_s21   ;;  %s2441_s21 = sphi %s2533_s21, %s29_s21   ;;  %s2437_s20 = sphi %s2531_s20, %s3190_s20   ;;  %s2433_s19 = sphi %s2529_s19, %s3189_s19   ;;  %s2429_s18 = sphi %s2527_s18, %s3188_s18   ;;  %s2425_s17 = sphi %s2525_s17, %s3187_s17   ;;  %s2421_s16 = sphi %s2523_s16, %s3186_s16   ;;  %s2417_s15 = sphi %s2521_s15, %s3185_s15   ;;  %s2413_s14 = sphi %s2519_s14, %s3184_s14   ;;  %s2409_s13 = sphi %s2517_s13, %s3183_s13   ;;  %s2405_s12 = sphi %s2515_s12, %s3182_s12   ;;  %s2401_s11 = sphi %s2513_s11, %s3181_s11   ;;  %s2397_s10 = sphi %s2511_s10, %s3180_s10   ;;  %s2393_s30 = sphi %s2509_s30, %s3179_s30  }
  0x18   : > { %3125 = sst [smem:[#allocation22_spill]] %s2417_s15  ;;  %p1755_p0 = scmp.ge.s32.totalorder %s2441_s21, 1 }
  0x19   : > { %3126 = sst [smem:[#allocation23_spill]] %s2421_s16  ;;  %p3103_p1 = scmp.eq.s32.totalorder %s2575_s22, 0 }
  0x1a   : > { %3127 = sst [smem:[#allocation24_spill]] %s2425_s17  ;;  %p284_p2 = scmp.lt.s32.totalorder %s2441_s21, 9 }
  0x1b   : > { %s2443_s24 = smov [#allocation11]   ;;  %s2444_s27 = smov [#allocation12]  }
  0x1c   : > { %p2580_p3 = pnand %p1755_p0, %p284_p2  ;;  %s302_s25 = sshll.u32 %s2443_s24, 4  ;;  %s2584_s25 = int_to_ptr.vmem [resolvable:$true] %s302_s25 }
  0x1d   : > { %s318_s28 = sshll.u32 %s2444_s27, 4  ;;  %s2445_s29 = smov [#allocation14]   ;;  %s2594_s28 = int_to_ptr.vmem [resolvable:$true] %s318_s28 }
  0x1e   : > { %s3128_s23 = scalar_select %p2580_p3, 1, 0 }
  0x1f   : > { %p1963_p4 = pneg %p2580_p3  ;;  %s2596_s9 = sshll.u32 %s2445_s29, 4  ;;  %s332_s9 = int_to_ptr.vmem [resolvable:$true] %s2596_s9 }
  0x20   : > { %3129 = sst [smem:[#allocation25_spill]] %s3128_s23  ;;  %s3131_s4 = sld [smem:[#allocation33_spill]] }
  0x21   : > { %p2590_p5 = pnand %p1963_p4, %p3103_p1 }
  0x23   : > { %p2606_p7 = pneg %p2590_p5 }
  0x26   : > { %s2147_s24 = scalar_lea.hbm %s3131_s4, 256 }
  0x27   : > { %p2148_p6 = scmp.ne.s32.totalorder %s3131_s4, %s2147_s24  ;;  %p2154_p10 = scmp.lt.u32.totalorder %s2147_s24, %s3131_s4 }
  0x29   : > { %p2150_p8 = pnand %p2606_p7, %p2148_p6 }
  0x2b   : > { %p2151_p9 = pneg %p2150_p8 }
  0x2d   : > { %p2156_p11 = pnand %p2154_p10, %p2151_p9 }
  0x2f   : > { %2159 = shalt.err (!%p2156_p11)
}
  0x30   : > { %s2160_s5 = scalar_lea.vmem %s2584_s25, 256  ;;  %p2168_p2 = scmp.lt.s32.totalorder %s2584_s25, %s2584_s25 }
  0x31   : > { %p2161_p12 = scmp.ne.s32.totalorder %s2584_s25, %s2160_s5  ;;  %p2169_p4 = scmp.lt.s32.totalorder %s2160_s5, %s2160_s5 }
  0x33   : > { %p2163_p13 = pnand %p2161_p12, %p2606_p7  ;;  %p2170_p6 = por %p2169_p4, %p2168_p2 }
  0x35   : > { %p2164_p0 = pneg %p2163_p13 }
  0x37   : > { %p2171_p8 = pnand %p2170_p6, %p2164_p0 }
  0x39   : > { %2174 = shalt.err (!%p2171_p8)
}
  0x3a   : > { %s2446_s8 = smov 64   ;;  %s2447_s16 = smov 4  }
  0x3b   : > { %1966 = dma.hbm_to_vmem [thread:$0]  (!%p2590_p5), %s3131_s4, 256, %s2584_s25, [#allocation10], %s2446_s8, %s2446_s8, %s2447_s16  }
  0x3c   : > { %s3133_s6 = sld [smem:[#allocation35_spill]] }
  0x42   : > { %s2175_s5 = scalar_lea.hbm %s3133_s6, 256 }
  0x43   : > { %p2176_p9 = scmp.ne.s32.totalorder %s3133_s6, %s2175_s5  ;;  %p2182_p12 = scmp.lt.u32.totalorder %s2175_s5, %s3133_s6 }
  0x45   : > { %p2178_p10 = pnand %p2176_p9, %p2606_p7 }
  0x47   : > { %p2179_p11 = pneg %p2178_p10 }
  0x49   : > { %p2184_p13 = pnand %p2182_p12, %p2179_p11 }
  0x4b   : > { %2187 = shalt.err (!%p2184_p13)
}
  0x4c   : > { %s2188_s25 = scalar_lea.vmem %s2594_s28, 256  ;;  %p2196_p6 = scmp.lt.s32.totalorder %s2594_s28, %s2594_s28 }
  0x4d   : > { %p2189_p0 = scmp.ne.s32.totalorder %s2594_s28, %s2188_s25  ;;  %p2197_p8 = scmp.lt.s32.totalorder %s2188_s25, %s2188_s25 }
  0x4f   : > { %p2191_p2 = pnand %p2189_p0, %p2606_p7  ;;  %p2198_p9 = por %p2197_p8, %p2196_p6 }
  0x51   : > { %p2192_p4 = pneg %p2191_p2 }
  0x53   : > { %p2199_p10 = pnand %p2198_p9, %p2192_p4 }
  0x55   : > { %2202 = shalt.err (!%p2199_p10)
}
  0x56   : > { %1969 = dma.hbm_to_vmem [thread:$0]  (!%p2590_p5), %s3133_s6, 256, %s2594_s28, [#allocation13], %s2446_s8, %s2446_s8, %s2447_s16  }
  0x57   : > { %s3134_s7 = sld [smem:[#allocation36_spill]] }
  0x5d   : > { %s2203_s17 = scalar_lea.hbm %s3134_s7, 256 }
  0x5e   : > { %p2204_p11 = scmp.ne.s32.totalorder %s3134_s7, %s2203_s17  ;;  %p2210_p0 = scmp.lt.u32.totalorder %s2203_s17, %s3134_s7 }
  0x60   : > { %p2206_p12 = pnand %p2204_p11, %p2606_p7 }
  0x62   : > { %p2207_p13 = pneg %p2206_p12 }
  0x64   : > { %p2212_p2 = pnand %p2210_p0, %p2207_p13 }
  0x66   : > { %2215 = shalt.err (!%p2212_p2)
}
  0x67   : > { %s2216_s25 = scalar_lea.vmem %s332_s9, 256  ;;  %p2224_p9 = scmp.lt.s32.totalorder %s332_s9, %s332_s9 }
  0x68   : > { %p2217_p4 = scmp.ne.s32.totalorder %s332_s9, %s2216_s25  ;;  %p2225_p10 = scmp.lt.s32.totalorder %s2216_s25, %s2216_s25 }
  0x6a   : > { %p2219_p6 = pnand %p2217_p4, %p2606_p7  ;;  %p2226_p1 = por %p2225_p10, %p2224_p9 }
  0x6c   : > { %p2220_p8 = pneg %p2219_p6 }
  0x6e   : > { %p2227_p3 = pnand %p2226_p1, %p2220_p8 }
  0x70   : > { %2230 = shalt.err (!%p2227_p3)
}
  0x71   : > { %1972 = dma.hbm_to_vmem [thread:$0]  (!%p2590_p5), %s3134_s7, 256, %s332_s9, [#allocation13], %s2446_s8, %s2446_s8, %s2447_s16  }
  0x72   : > { %s1754_s3 = sadd.s32 4294967294, %s2441_s21   ;;  %s41_s26 = sadd.s32 1, %s2429_s18 }
  0x73   : > { %s44_s2 = sadd.s32 1, %s2433_s19  ;;  %p42_p1 = scmp.ge.s32.totalorder %s41_s26, 2 }
  0x74   : > { %s48_s15 = sadd.s32 1, %s2437_s20  ;;  %s57_s23 = sadd.s32 1, %s2413_s14 }
  0x75   : > { %p64_p3 = scmp.ne.s32.totalorder %s2413_s14, %s2409_s13  ;;  %s3192_s26 = smov (%p42_p1, %s41_s26), 0 }
  0x76   : > { %3135 = sst [smem:[#allocation26_spill]] %s3192_s26  ;;  %s3194_s2 = smov (!%p42_p1, %s44_s2), %s2433_s19 }
  0x77   : > { %p3112_p5 = scmp.eq.s32.totalorder %s2441_s21, 0  ;;  %p70_p7 = scmp.ne.s32.totalorder %s2409_s13, %s2405_s12 }
  0x78   : > { %p46_p11 = scmp.ge.s32.totalorder %s3194_s2, 2  ;;  %s81_s9 = ssub.s32 %s2429_s18, %s3192_s26 }
  0x79   : > { %p2698_p12 = por %p3112_p5, %p64_p3  ;;  %p3137_p13 = scmp.eq.s32.totalorder %s2575_s22, 0 }
  0x7a   : > { %s3196_s2 = smov (%p46_p11, %s3194_s2), 0  ;;  %s3198_s15 = smov (!%p46_p11, %s48_s15), %s2437_s20 }
  0x7b   : > { %p2707_p0 = por %p3137_p13, %p70_p7  ;;  %3139 = sst [smem:[#allocation27_spill]] %s3196_s2 }
  0x7c   : > { %s53_s17 = ssub.s32 %s2433_s19, %s3196_s2  ;;  %p271_p2 = scmp.eq.s32.totalorder %s2575_s22, 7 }
  0x7d   : > { %p50_p4 = scmp.ge.s32.totalorder %s3198_s15, 2  ;;  %p277_p6 = scmp.eq.s32.totalorder %s1754_s3, 7 }
  0x7e   : > { %p2720_p8 = por %p271_p2, %p64_p3  ;;  %p3111_p9 = scmp.lt.s32.totalorder %s2441_s21, 8 }
  0x7f   : > { %s3200_s15 = smov (%p50_p4, %s3198_s15), 0  ;;  %p2730_p10 = por %p277_p6, %p70_p7 }
  0x80   : > { %s3140_s24 = scalar_select %p2720_p8, 1, 0 }
  0x81   : > { %s3142_s27 = scalar_select %p2730_p10, 1, 0 }
  0x82   : > { %3141 = sst [smem:[#allocation28_spill]] %s3140_s24  ;;  %s348_s29 = sand.u32 1, %s2413_s14  }
  0x83   : > { %3143 = sst [smem:[#allocation29_spill]] %s3142_s27  ;;  %s52_s5 = ssub.s32 %s2437_s20, %s3200_s15 }
  0x84   : > { %s54_s25 = sor.u32 %s53_s17, %s52_s5  ;;  %s2737_s28 = sor.u32 %s81_s9, %s52_s5 }
  0x85   : > { %p55_p1 = scmp.eq.s32.totalorder %s54_s25, 0  ;;  %s1760_s1 = sshll.u32 %s348_s29, 3 }
  0x86   : > { %s1761_s3 = sshll.u32 %s2437_s20, 1  ;;  %s352_s2 = scalar_lea.vmem [#allocation6], %s1760_s1 }
  0x87   : > { %s2742_s4 = scalar_select %p55_p1, %s2413_s14, %s57_s23  }
  0x88   : > { %s357_s6 = sadd.s32 %s2433_s19, %s1761_s3  ;;  %s361_s26 = sshll.u32 %s352_s2, 4  ;;  %s2750_s26 = int_to_ptr.vmem [resolvable:$true] %s361_s26 }
  0x89   : > { %s1762_s7 = sshll.u32 %s357_s6, 7  ;;  %p2756_p7 = pnand %p3111_p9, %p2698_p12 }
  0x8a   : > { %s2748_s24 = scalar_lea.hbm %s3089_s0, %s1762_s7  ;;  %s2761_s6 = sadd.s32 %s2429_s18, %s1761_s3 }
  0x8b   : > { %s349_s2 = scalar_lea.sflag [#allocation7], %s348_s29  ;;  %s2231_s12 = scalar_lea.hbm %s2748_s24, 128 }
  0x8c   : > { %p2232_p11 = scmp.ne.s32.totalorder %s2748_s24, %s2231_s12  ;;  %p2233_p13 = pneg %p2756_p7 }
  0x8d   : > { %s2236_s8 = scalar_lea.hbm %s3089_s0, 512  ;;  %p2237_p12 = scmp.lt.u32.totalorder %s2748_s24, %s3089_s0 }
  0x8e   : > { %p2234_p2 = pnand %p2233_p13, %p2232_p11  ;;  %p2238_p6 = scmp.lt.u32.totalorder %s2236_s8, %s2231_s12 }
  0x8f   : > { %p2240_p9 = scmp.lt.u32.totalorder %s2231_s12, %s2748_s24 }
  0x90   : > { %p2235_p4 = pneg %p2234_p2  ;;  %p2239_p1 = por %p2238_p6, %p2237_p12 }
  0x92   : > { %p2241_p5 = por %p2240_p9, %p2239_p1 }
  0x94   : > { %p2242_p3 = pnand %p2241_p5, %p2235_p4 }
  0x96   : > { %2245 = shalt.err (!%p2242_p3)
}
  0x97   : > { %s2246_s29 = scalar_lea.vmem %s2750_s26, 128  ;;  %s2448_s5 = smov [#allocation6]  }
  0x98   : > { %p2247_p11 = scmp.ne.s32.totalorder %s2750_s26, %s2246_s29  ;;  %s2251_s25 = sshll.u32 %s2448_s5, 4  ;;  %s2252_s25 = int_to_ptr.vmem [resolvable:$false] %s2251_s25 }
  0x99   : > { %s2253_s1 = scalar_lea.vmem %s2252_s25, 256  ;;  %p2254_p8 = scmp.lt.s32.totalorder %s2750_s26, %s2252_s25 }
  0x9a   : > { %p2249_p2 = pnand %p2247_p11, %p2233_p13  ;;  %p2255_p12 = scmp.lt.s32.totalorder %s2253_s1, %s2246_s29 }
  0x9c   : > { %p2250_p10 = pneg %p2249_p2  ;;  %p2256_p6 = por %p2255_p12, %p2254_p8 }
  0x9e   : > { %p2257_p9 = pnand %p2256_p6, %p2250_p10 }
  0xa0   : > { %2260 = shalt.err (!%p2257_p9)
}
  0xa1   : > { %1976 = dma.hbm_to_vmem [thread:$0]  (!%p2756_p7), %s2748_s24, 128, %s2750_s26, %s349_s2  }
  0xa2   : > { %s85_s3 = sadd.s32 1, %s2401_s11  ;;  %p3145_p5 = scmp.eq.s32.totalorder %s2737_s28, 0 }
  0xa3   : > { %p92_p8 = scmp.ne.s32.totalorder %s2401_s11, %s2397_s10  ;;  %p98_p10 = scmp.ne.s32.totalorder %s2397_s10, %s2393_s30 }
  0xa4   : > { %s2792_s12 = scalar_select %p3145_p5, %s2401_s11, %s85_s3  }
  0xa5   : > { %s368_s23 = sand.u32 1, %s2441_s21   ;;  %s370_s7 = sand.u32 1, %s2401_s11  }
  0xa6   : > { %p3146_p3 = scmp.eq.s32.totalorder %s2441_s21, 0  ;;  %p3147_p4 = scmp.eq.s32.totalorder %s2575_s22, 0 }
  0xa7   : > { %s1763_s8 = sshll.u32 %s370_s7, 3  ;;  %s1765_s17 = sshll.u32 %s2761_s6, 7 }
  0xa8   : > { %p94_p13 = por %p92_p8, %p3146_p3  ;;  %p2804_p1 = por %p98_p10, %p3147_p4 }
  0xa9   : > { %s3149_s26 = sld [smem:[#allocation30_spill]]  ;;  %s372_s30 = scalar_lea.vmem [#allocation9], %s1763_s8 }
  0xaa   : > { %s3148_s9 = scalar_select %p2804_p1, 1, 0 }
  0xab   : > { %s381_s28 = sshll.u32 %s372_s30, 4  ;;  %p3150_p7 = scmp.lt.s32.totalorder %s2441_s21, 8  ;;  %s2814_s28 = int_to_ptr.vmem [resolvable:$true] %s381_s28 }
  0xac   : > { %s369_s6 = scalar_lea.sflag [#allocation10], %s368_s23 }
  0xad   : > { %p2818_p11 = pnand %p3150_p7, %p94_p13 }
  0xaf   : > { %s2812_s24 = scalar_lea.hbm %s3149_s26, %s1765_s17  ;;  %p2263_p12 = pneg %p2818_p11 }
  0xb0   : > { %s2261_s5 = scalar_lea.hbm %s2812_s24, 128  ;;  %s2266_s3 = scalar_lea.hbm %s3149_s26, 512 }
  0xb1   : > { %p2262_p2 = scmp.ne.s32.totalorder %s2812_s24, %s2261_s5  ;;  %p2267_p5 = scmp.lt.u32.totalorder %s2812_s24, %s3149_s26 }
  0xb2   : > { %p2268_p8 = scmp.lt.u32.totalorder %s2266_s3, %s2261_s5  ;;  %p2270_p3 = scmp.lt.u32.totalorder %s2261_s5, %s2812_s24 }
  0xb3   : > { %p2264_p6 = pnand %p2263_p12, %p2262_p2 }
  0xb4   : > { %p2269_p10 = por %p2268_p8, %p2267_p5 }
  0xb5   : > { %p2265_p9 = pneg %p2264_p6 }
  0xb6   : > { %p2271_p13 = por %p2270_p3, %p2269_p10 }
  0xb8   : > { %p2272_p4 = pnand %p2271_p13, %p2265_p9 }
  0xba   : > { %2275 = shalt.err (!%p2272_p4)
}
  0xbb   : > { %s2276_s23 = scalar_lea.vmem %s2814_s28, 128  ;;  %s2449_s17 = smov [#allocation9]  }
  0xbc   : > { %p2277_p7 = scmp.ne.s32.totalorder %s2814_s28, %s2276_s23  ;;  %s2281_s27 = sshll.u32 %s2449_s17, 4  ;;  %s2282_s27 = int_to_ptr.vmem [resolvable:$false] %s2281_s27 }
  0xbd   : > { %s2283_s29 = scalar_lea.vmem %s2282_s27, 256  ;;  %p2284_p1 = scmp.lt.s32.totalorder %s2814_s28, %s2282_s27 }
  0xbe   : > { %p2279_p2 = pnand %p2277_p7, %p2263_p12  ;;  %p2285_p5 = scmp.lt.s32.totalorder %s2283_s29, %s2276_s23 }
  0xc0   : > { %p2280_p6 = pneg %p2279_p2  ;;  %p2286_p8 = por %p2285_p5, %p2284_p1 }
  0xc2   : > { %p2287_p10 = pnand %p2286_p8, %p2280_p6 }
  0xc4   : > { %2290 = shalt.err (!%p2287_p10)
}
  0xc5   : > { %1979 = dma.hbm_to_vmem [thread:$0]  (!%p2818_p11), %s2812_s24, 128, %s2814_s28, %s369_s6  }
  0xc6   : > { %s3152_s30 = sld [smem:[#allocation25_spill]] }
  0xcc   : > { %p3153_p9 = scmp.ne.s32.totalorder %s3152_s30, 0 }
  0xcd   : > { %s2850_s5 = sand.u32 (!%p3153_p9), 1, %s2409_s13  }
  0xce   : > { %390 = sbr.rel (%p3153_p9) target bundleno = 2377 (0x949), region = 56  ;;  %s1767_s25 = sshll.u32 (!%p3153_p9), %s2850_s5, 3 }
  0xcf   : > { %s393_s1 = scalar_lea.sflag (!%p3153_p9), [#allocation7], %s2850_s5  ;;  %s2854_s3 = scalar_lea.vmem (!%p3153_p9), [#allocation6], %s1767_s25 }
  0xd5   : > { %2372 = dma.done.wait (%p2707_p0), %s393_s1, 128  }
  0xd6   : > { %2374 = vsyncadd (%p2707_p0), %s393_s1, 4294967168  ;;  %s401_s24 = sand.u32 1, %s2575_s22   ;;  %s403_s28 = sand.u32 1, %s2397_s10  }
  0xd7   : > { %s2862_s2 = sshll.u32 %s403_s28, 3  ;;  %s402_s6 = scalar_lea.sflag [#allocation10], %s401_s24 }
  0xd8   : > { %s405_s7 = scalar_lea.vmem [#allocation9], %s2862_s2  ;;  %p3154_p1 = scmp.ne.s32.totalorder %s3148_s9, 0 }
  0xda   : > { %2376 = dma.done.wait (%p3154_p1), %s402_s6, 128  }
  0xdb   : > { %2378 = vsyncadd (%p3154_p1), %s402_s6, 4294967168  ;;  %p3155_p11 = scmp.eq.s32.totalorder %s2575_s22, 0 }
  0xdd   : > { %2380 = dma.done.wait (%p3155_p11), [#allocation10], 256   ;;  %p3156_p0 = pmov %p3155_p11 }
  0xdf   : > { %2382 = vsyncadd (%p3156_p0), [#allocation10], 4294967040  ;;  %p3157_p12 = pmov %p3156_p0 }
  0xe0   : > { %p3158_p3 = pmov %p3156_p0 }
  0xe1   : > { %2384 = dma.done.wait (%p3157_p12), [#allocation13], 512  }
  0xe2   : > { %2386 = vsyncadd (%p3158_p3), [#allocation13], 4294966784  ;;  %s2877_s16 = scalar_lea.vmem [#allocation15], %s1767_s25  ;;  %s3159_s8 = sld [smem:[#allocation22_spill]] }
  0xe8   : > { %p1773_p13 = scmp.ne.s32.totalorder %s3159_s8, 0 }
  0xe9   : > { %v462_v0 = vld [vmem:[%s2854_s3] sm:$0xff] (!%p1773_p13)  ;;  %vm465_vm0 = vcmask (!%p1773_p13), 261120   ;;  %s3160_s23 = sld [smem:[#allocation31_spill]] (!%p1773_p13)  ;;  %s3161_s29 = sld [smem:[#allocation32_spill]] (!%p1773_p13)  ;;  %vm576_vm1 = vcmask (!%p1773_p13), 7168   ;;  %vm585_vm2 = vcmask (!%p1773_p13), 64512  }
  0xea   : > { %461 = sbr.rel (%p1773_p13) target bundleno = 775 (0x307), region = 80  ;;  %v466_v1 = vsel (!%p1773_p13), %vm465_vm0, %v462_v0, 0.0  ;;  %v2109_v7 = vld [vmem:[#allocation11] sm:$0xff] (!%p1773_p13)   ;;  %v2110_v19 = vld [vmem:[#allocation11 + $0x8] sm:$0xff] (!%p1773_p13)   ;;  %v2450_v20 = vmov (!%p1773_p13), -inf   ;;  %v2451_v21 = vmov (!%p1773_p13), 0.0  }
  0xeb   : > { %467 = vadd.xlane.f32.xlu0 (!%p1773_p13), %v466_v1  ;;  %1844 = vmatprep.mubr.msk.bf16.mxu0 (!%p1773_p13), %vm465_vm0, %v2109_v7  ;;  %577 = vst.msk [vmem:[#allocation3] sm:$0xff] (!%p1773_p13), %vm576_vm1, %v2450_v20  ;;  %578 = vst.msk [vmem:[#allocation3 + $0x8] sm:$0xff] (!%p1773_p13), %vm576_vm1, %v2450_v20  ;;  %vm571_vm3 = vcmask (!%p1773_p13), 60416  }
  0xec   : > { %579 = vst.msk [vmem:[#allocation3 + $0x10] sm:$0xff] (!%p1773_p13), %vm576_vm1, %v2450_v20  ;;  %580 = vst.msk [vmem:[#allocation3 + $0x18] sm:$0xff] (!%p1773_p13), %vm576_vm1, %v2450_v20 }
  0xed   : > { %581 = vst.msk [vmem:[#allocation4] sm:$0xff] (!%p1773_p13), %vm576_vm1, %v2451_v21  ;;  %582 = vst.msk [vmem:[#allocation4 + $0x8] sm:$0xff] (!%p1773_p13), %vm576_vm1, %v2451_v21 }
  0xee   : > { %583 = vst.msk [vmem:[#allocation4 + $0x10] sm:$0xff] (!%p1773_p13), %vm576_vm1, %v2451_v21  ;;  %584 = vst.msk [vmem:[#allocation4 + $0x18] sm:$0xff] (!%p1773_p13), %vm576_vm1, %v2451_v21 }
  0xef   : > { %v1774_v12 = vld [vmem:[%s3160_s23] ss:$0 sm:$0xff] (!%p1773_p13)  ;;  %586 = vst.msk [vmem:[#allocation5] sm:$0xff] (!%p1773_p13), %vm585_vm2, %v2451_v21  ;;  %587 = vst.msk [vmem:[#allocation5 + $0x8] sm:$0xff] (!%p1773_p13), %vm585_vm2, %v2451_v21 }
  0xf0   : > { %v1775_v14 = vld [vmem:[%s3161_s29] ss:$0 sm:$0xff] (!%p1773_p13)  ;;  %588 = vst.msk [vmem:[#allocation5 + $0x10] sm:$0xff] (!%p1773_p13), %vm585_vm2, %v2451_v21  ;;  %589 = vst.msk [vmem:[#allocation5 + $0x18] sm:$0xff] (!%p1773_p13), %vm585_vm2, %v2451_v21 }
 0x178   : > { %v468_v2 = vpop.xlane.xlu0 %467 }
 0x179   : > { %v470_v3 = vmul.f32 0.03125, %v468_v2 }
 0x17b   : > { %v471_v4 = vsub.f32 %v462_v0, %v470_v3 }
 0x17d   : > { %v472_v5 = vmul.f32 %v471_v4, %v471_v4 }
 0x17f   : > { %v473_v6 = vsel %vm465_vm0, %v472_v5, 0.0 }
 0x180   : > { %474 = vadd.xlane.f32.xlu0 %v473_v6 }
 0x20d   : > { %v475_v8 = vpop.xlane.xlu0 %474 }
 0x20e   : > { %v476_v9 = vmul.f32 0.03125, %v475_v8 }
 0x210   : > { %v477_v10 = vadd.f32 1e-05, %v476_v9 }
 0x212   : > { %2111 = vrsqrt.f32 %v477_v10 }
 0x21c   : > { %v2112_v11 = vpop.eup %2111 }
 0x21d   : > { %v479_v13 = vmul.f32 %v2112_v11, %v471_v4 }
 0x21f   : > { %v486_v15 = vmul.f32 %v1774_v12, %v479_v13 }
 0x221   : > { %v493_v16 = vadd.f32 %v1775_v14, %v486_v15 }
 0x223   : > { %v498_v17 = vpack.c.bf16 %v493_v16, %v493_v16 }
 0x225   : > { %1942 = vmatprep.subr.msk.bf16.mxu0 %vm465_vm0, %v498_v17  ;;  %v516_v18 = vsel %vm465_vm0, %v498_v17, 0 }
 0x226   : > { %1843 = vmatpush3.bf16.xpose.msra.mxu0 %v516_v18 }
 0x22d   : > { %1845 = vmatmul.mubr.msk.bf16.vlgmr.msra.gmra.mrb[0].mxu0 %vm465_vm0, %v2110_v19 }
 0x300   : > { %v1846_v22 = vpop.f32.mrb[0].mxu0 }
 0x301   : > { %v569_v23 = vpack.c.bf16 %v1846_v22, %v1846_v22  ;;  %v552_v24 = vpop.f32.mrb[1].mxu0 }
 0x302   : > { %v567_v25 = vpack.c.bf16 %v552_v24, %v552_v24  ;;  %v1847_v26 = vpop.f32.mrb[2].mxu0 }
 0x303   : > { %574 = vst.msk [vmem:[#allocation2 + $0x8] sm:$0xf] %vm571_vm3, %v569_v23  ;;  %v570_v27 = vpack.c.bf16 %v1847_v26, %v1847_v26  ;;  %v555_v28 = vpop.f32.mrb[3].mxu0 }
 0x304   : > { %572 = vst.msk [vmem:[#allocation2] sm:$0xf] %vm571_vm3, %v567_v25  ;;  %v568_v29 = vpack.c.bf16 %v555_v28, %v555_v28 }
 0x305   : > { %575 = vst.msk [vmem:[#allocation2 + $0xc] sm:$0xf] %vm571_vm3, %v570_v27 }
 0x306   : > { %573 = vst.msk [vmem:[#allocation2 + $0x4] sm:$0xf] %vm571_vm3, %v568_v29 }
 0x307 PF: > { %v590_v30 = vld [vmem:[%s405_s7] sm:$0xff]  ;;  %vm593_vm4 = vcmask 261120   ;;  %s3162_s1 = sld [smem:[#allocation34_spill]]  ;;  %s3163_s2 = sld [smem:[#allocation31_spill]]  ;;  %v2452_v56 = vmov 0.0   ;;  %vm2453_vm5 = vmmov 0  }
 0x308   : > { %v594_v31 = vsel %vm593_vm4, %v590_v30, 0.0  ;;  %s3164_s8 = sld [smem:[#allocation32_spill]]  ;;  %v2117_v54 = vld [vmem:[#allocation12] sm:$0xff]   ;;  %v2118_v55 = vld [vmem:[#allocation12 + $0x8] sm:$0xff]   ;;  %vm796_vm6 = vcmask 1043456   ;;  %vm792_vm7 = vcmask 64512  }
 0x309   : > { %595 = vadd.xlane.f32.xlu0 %v594_v31  ;;  %1856 = vmatprep.mubr.msk.bf16.mxu1 %vm593_vm4, %v2117_v54  ;;  %vm1114_vm8 = vcmask 7168   ;;  %s3165_s23 = sld [smem:[#allocation22_spill]] }
 0x30a   : > { %v774_v39 = vld [vmem:[#allocation2 + $0x8] sm:$0xf] }
 0x30b   : > { %v772_v38 = vld [vmem:[#allocation2] sm:$0xf] }
 0x30c   : > { %776 = vxpose.xlu1.c.b16.start.end [1/1] (short) (narrow) %v772_v38, 16  ;;  %v775_v41 = vld [vmem:[#allocation2 + $0xc] sm:$0xf]  ;;  %v1026_v38 = vld [vmem:[#allocation3] sm:$0xff] }
 0x30d   : > { %v2115_v37 = vld [vmem:[%s3162_s1] sm:$0xff]   ;;  %v2116_v53 = vld [vmem:[%s3162_s1 + $0x8] sm:$0xff]  }
 0x30e   : > { %1850 = vmatprep.mubr.msk.bf16.mxu0 %vm593_vm4, %v2115_v37  ;;  %v773_v40 = vld [vmem:[#allocation2 + $0x4] sm:$0xf]  ;;  %v1780_v46 = vld [vmem:[%s3163_s2] ss:$0 sm:$0xff]  ;;  %v2454_v37 = vmov 0  }
 0x30f   : > { %v1781_v48 = vld [vmem:[%s3164_s8] ss:$0 sm:$0xff]  ;;  %p1798_p4 = scmp.ne.s32.totalorder %s3165_s23, 1 }
 0x310   : > { %840 = vxpose.xlu1.c.b16.start.end [1/1] (short) (narrow) %v773_v40, 16  ;;  %vm2457_vm9 = vmmov (!%p1798_p4), 0   ;;  %s3166_s29 = sld [smem:[#allocation37_spill]] (!%p1798_p4) }
 0x314   : > { %964 = vxpose.xlu1.c.b16.start.end [1/1] (short) (narrow) %v775_v41, 16  ;;  %v2954_v41 = vld [vmem:[#allocation3 + $0x8] sm:$0xff] }
 0x318   : > { %2113 = vset.pattern.permute.xlu1 %v2454_v37 }
 0x372   : > { %v784_v59 = vpop.trf.xlu1 }
 0x376   : > { %v848_v4 = vpop.trf.xlu1 }
 0x37a   : > { %v972_v8 = vpop.trf.xlu1 }
 0x396   : > { %v596_v32 = vpop.xlane.xlu0 %595 }
 0x397   : > { %v598_v33 = vmul.f32 0.03125, %v596_v32 }
 0x399   : > { %v599_v34 = vsub.f32 %v590_v30, %v598_v33 }
 0x39b   : > { %v600_v35 = vmul.f32 %v599_v34, %v599_v34 }
 0x39d   : > { %v601_v36 = vsel %vm593_vm4, %v600_v35, 0.0 }
 0x39e   : > { %602 = vadd.xlane.f32.xlu0 %v601_v36 }
 0x3cb   : > { %902 = vxpose.xlu0.c.b16.start.end [1/1] (short) (narrow) %v774_v39, 16 }
 0x3d4   : > { %2114 = vset.pattern.permute.xlu0 %v2454_v37 }
 0x42b   : > { %v603_v42 = vpop.xlane.xlu0 %602 }
 0x42c   : > { %v604_v43 = vmul.f32 0.03125, %v603_v42 }
 0x42e   : > { %v605_v44 = vadd.f32 1e-05, %v604_v43 }
 0x430   : > { %2119 = vrsqrt.f32 %v605_v44 }
 0x431   : > { %v910_v7 = vpop.trf.xlu0 }
 0x43a   : > { %v2120_v45 = vpop.eup %2119 }
 0x43b   : > { %v607_v47 = vmul.f32 %v2120_v45, %v599_v34 }
 0x43d   : > { %v614_v49 = vmul.f32 %v1780_v46, %v607_v47  ;;  %v1028_v46 = vld [vmem:[#allocation3 + $0x10] sm:$0xff] }
 0x43f   : > { %v621_v50 = vadd.f32 %v1781_v48, %v614_v49 }
 0x441   : > { %v622_v51 = vpack.c.bf16 %v621_v50, %v621_v50  ;;  %v1029_v50 = vld [vmem:[#allocation3 + $0x18] sm:$0xff] }
 0x443   : > { %1943 = vmatprep.subr.msk.bf16.mxu0 %vm593_vm4, %v622_v51  ;;  %1944 = vmatprep.subr.msk.bf16.mxu1 %vm593_vm4, %v622_v51  ;;  %v644_v52 = vsel %vm593_vm4, %v622_v51, 0 }
 0x444   : > { %1849 = vmatpush3.bf16.xpose.msra.mxu0 %v644_v52  ;;  %1855 = vmatpush3.bf16.xpose.msra.mxu1 %v644_v52 }
 0x445   : > { %1860 = vmatprep.subr.bf16.mxu0 %v2452_v56  ;;  %1866 = vmatprep.subr.bf16.mxu1 %v2452_v56 }
 0x44b   : > { %1851 = vmatmul.mubr.msk.bf16.vlgmr.msra.gmra.mrb[0].mxu0 %vm593_vm4, %v2116_v53  ;;  %1857 = vmatmul.mubr.msk.bf16.vlgmr.msra.gmra.mrb[0].mxu1 %vm593_vm4, %v2118_v55 }
 0x44c   : > { %1862 = vmatprep.mubr.msk.bf16.mxu0 %vm2453_vm5, %v2452_v56  ;;  %1868 = vmatprep.mubr.msk.bf16.mxu1 %vm2453_vm5, %v2452_v56 }
 0x51e   : > { %v1852_v57 = vpop.f32.mrb[0].mxu0  ;;  %v2942_v9 = vpop.f32.mrb[0].mxu1 }
 0x51f   : > { %v680_v58 = vpop.f32.mrb[1].mxu0  ;;  %v697_v63 = vpack.c.bf16 %v1852_v57, %v1852_v57  ;;  %v753_v10 = vpop.f32.mrb[1].mxu1 }
 0x520   : > { %v695_v60 = vpack.c.bf16 %v680_v58, %v680_v58  ;;  %v1853_v61 = vpop.f32.mrb[2].mxu0  ;;  %v768_v11 = vpack.c.bf16 %v753_v10, %v753_v10  ;;  %v2944_v12 = vpop.f32.mrb[2].mxu1 }
 0x521   : > { %v683_v62 = vpop.f32.mrb[3].mxu0  ;;  %v698_v2 = vpack.c.bf16 %v1853_v61, %v1853_v61  ;;  %v922_v5 = vsel %vm796_vm6, %v697_v63, 0  ;;  %v756_v13 = vpop.f32.mrb[3].mxu1 }
 0x522   : > { %v798_v0 = vsel %vm796_vm6, %v695_v60, 0  ;;  %v696_v1 = vpack.c.bf16 %v683_v62, %v683_v62  ;;  %v1127_v14 = vsel %vm792_vm7, %v768_v11, 0  ;;  %v769_v15 = vpack.c.bf16 %v756_v13, %v756_v13 }
 0x523   : > { %1861 = vmatpush3.bf16.msra.mxu0 %v798_v0  ;;  %v984_v6 = vsel %vm796_vm6, %v698_v2, 0  ;;  %v771_v11 = vpack.c.bf16 %v2944_v12, %v2944_v12 }
 0x524   : > { %v860_v3 = vsel %vm796_vm6, %v696_v1, 0  ;;  %1872 = vmatprep.subr.bf16.mxu0 %v2452_v56  ;;  %v1173_v16 = vsel %vm792_vm7, %v769_v15, 0 }
 0x525   : > { %1867 = vmatpush3.bf16.msra.mxu1 %v860_v3  ;;  %v1265_v15 = vsel %vm792_vm7, %v771_v11, 0 }
 0x526   : > { %1863 = vmatmul.mubr.msk.bf16.vlgmr.msra.gmra.mrb[4].mxu0 %vm792_vm7, %v784_v59  ;;  %1878 = vmatprep.subr.bf16.mxu1 %v2452_v56 }
 0x527   : > { %1873 = vmatpush3.bf16.msra.mxu0 %v922_v5  ;;  %1874 = vmatprep.mubr.msk.bf16.mxu0 %vm2453_vm5, %v2452_v56 }
 0x528   : > { %1869 = vmatmul.mubr.msk.bf16.vlgmr.msra.gmra.mrb[4].mxu1 %vm792_vm7, %v848_v4  ;;  %1884 = vmatprep.subr.bf16.mxu0 %v2452_v56  ;;  %v770_v4 = vpack.c.bf16 %v2942_v9, %v2942_v9 }
 0x529   : > { %1879 = vmatpush3.bf16.msra.mxu1 %v984_v6  ;;  %1880 = vmatprep.mubr.msk.bf16.mxu1 %vm2453_vm5, %v2452_v56 }
 0x52a   : > { %1890 = vmatprep.subr.bf16.mxu1 %v2452_v56  ;;  %v1219_v10 = vsel %vm792_vm7, %v770_v4, 0 }
 0x52e   : > { %1875 = vmatmul.mubr.msk.bf16.vlgmr.msra.gmra.mrb[8].mxu0 %vm792_vm7, %v910_v7 }
 0x52f   : > { %1886 = vmatprep.mubr.msk.bf16.mxu0 %vm2453_vm5, %v2452_v56 }
 0x530   : > { %1881 = vmatmul.mubr.msk.bf16.vlgmr.msra.gmra.mrb[8].mxu1 %vm792_vm7, %v972_v8  ;;  %1885 = vmatpush3.bf16.xpose.msra.mxu0 %v1127_v14 }
 0x531   : > { %1892 = vmatprep.mubr.msk.bf16.mxu1 %vm2453_vm5, %v2452_v56  ;;  %1896 = vmatprep.subr.bf16.mxu0 %v2452_v56 }
 0x532   : > { %1891 = vmatpush3.bf16.xpose.msra.mxu1 %v1173_v16 }
 0x533   : > { %1902 = vmatprep.subr.bf16.mxu1 %v2452_v56 }
 0x5f9   : > { %v834_v17 = vpop.f32.mrb[4].mxu0 }
 0x5fa   : > { %v1030_v18 = vsel %vm792_vm7, %v834_v17, -inf  ;;  %v1864_v19 = vpop.f32.mrb[5].mxu0 }
 0x5fb   : > { %1031 = vmax.xlane.f32.xlu1 %v1030_v18  ;;  %v837_v20 = vpop.f32.mrb[6].mxu0  ;;  %v896_v21 = vpop.f32.mrb[4].mxu1 }
 0x5fc   : > { %v1865_v22 = vpop.f32.mrb[7].mxu0  ;;  %v1033_v23 = vsel %vm792_vm7, %v896_v21, -inf  ;;  %v1870_v24 = vpop.f32.mrb[5].mxu1 }
 0x5fd   : > { %v899_v25 = vpop.f32.mrb[6].mxu1 }
 0x5fe   : > { %v1871_v26 = vpop.f32.mrb[7].mxu1 }
 0x5ff   : > { %1034 = vmax.xlane.f32.xlu1 %v1033_v23  ;;  %v1090_v26 = vld [vmem:[#allocation4] sm:$0xff] }
 0x601   : > { %v958_v27 = vpop.f32.mrb[8].mxu0 }
 0x602   : > { %v1036_v28 = vsel %vm792_vm7, %v958_v27, -inf  ;;  %v1876_v29 = vpop.f32.mrb[9].mxu0 }
 0x603   : > { %1037 = vmax.xlane.f32.xlu1 %v1036_v28  ;;  %v961_v30 = vpop.f32.mrb[10].mxu0  ;;  %v1020_v31 = vpop.f32.mrb[8].mxu1 }
 0x604   : > { %v1877_v32 = vpop.f32.mrb[11].mxu0  ;;  %v1039_v33 = vsel %vm792_vm7, %v1020_v31, -inf  ;;  %v1882_v34 = vpop.f32.mrb[9].mxu1  ;;  %v1091_v30 = vld [vmem:[#allocation4 + $0x8] sm:$0xff] }
 0x605   : > { %v1023_v35 = vpop.f32.mrb[10].mxu1  ;;  %v1092_v34 = vld [vmem:[#allocation4 + $0x10] sm:$0xff] }
 0x606   : > { %v1883_v36 = vpop.f32.mrb[11].mxu1 }
 0x607   : > { %1040 = vmax.xlane.f32.xlu1 %v1039_v33 }
 0x688   : > { %v1032_v39 = vpop.xlane.xlu1 %1031 }
 0x689   : > { %v1042_v40 = vmax.f32 %v1026_v38, %v1032_v39 }
 0x68b   : > { %v1046_v42 = vsub.f32 %v1026_v38, %v1042_v40  ;;  %1343 = vst.msk [vmem:[#allocation3] sm:$0xff] %vm1114_vm8, %v1042_v40  ;;  %1060 = vperm.xlu1 %2113, %v1042_v40   ;;  %v1093_v38 = vld [vmem:[#allocation4 + $0x18] sm:$0xff] }
 0x68c   : > { %v1035_v43 = vpop.xlane.xlu1 %1034 }
 0x68d   : > { %v1050_v44 = vmul.f32 1.442695, %v1046_v42  ;;  %v2958_v45 = vmax.f32 %v2954_v41, %v1035_v43  ;;  %v1307_v43 = vld [vmem:[#allocation5] sm:$0xff] }
 0x68f   : > { %2121 = vpow2.f32 %v1050_v44  ;;  %v1047_v47 = vsub.f32 %v2954_v41, %v2958_v45  ;;  %1344 = vst.msk [vmem:[#allocation3 + $0x8] sm:$0xff] %vm1114_vm8, %v2958_v45  ;;  %1065 = vperm.xlu0 %2114, %v2958_v45   ;;  %v1308_v45 = vld [vmem:[#allocation5 + $0x8] sm:$0xff] }
 0x690   : > { %v1038_v48 = vpop.xlane.xlu1 %1037 }
 0x691   : > { %v1044_v49 = vmax.f32 %v1028_v46, %v1038_v48 }
 0x693   : > { %v1048_v51 = vsub.f32 %v1028_v46, %v1044_v49  ;;  %1345 = vst.msk [vmem:[#allocation3 + $0x10] sm:$0xff] %vm1114_vm8, %v1044_v49  ;;  %1070 = vperm.xlu1 %2113, %v1044_v49  }
 0x694   : > { %v1041_v52 = vpop.xlane.xlu1 %1040 }
 0x695   : > { %v1045_v53 = vmax.f32 %v1029_v50, %v1041_v52 }
 0x697   : > { %v1049_v54 = vsub.f32 %v1029_v50, %v1045_v53  ;;  %1346 = vst.msk [vmem:[#allocation3 + $0x18] sm:$0xff] %vm1114_vm8, %v1045_v53  ;;  %1075 = vperm.xlu1 %2113, %v1045_v53  }
 0x699   : > { %v2122_v55 = vpop.eup %2121  ;;  %v1056_v20 = vmul.f32 1.442695, %v1049_v54  ;;  %v1309_v54 = vld [vmem:[#allocation5 + $0x10] sm:$0xff] }
 0x69b   : > { %1313 = vperm.xlu1 %2113, %v2122_v55  }
 0x70a   : > { %v1061_v57 = vpop.permute.xlu1 %1060 }
 0x70b   : > { %v1078_v58 = vsub.f32 %v834_v17, %v1061_v57  ;;  %v1054_v17 = vmul.f32 1.442695, %v1048_v51 }
 0x70d   : > { %v1082_v59 = vmul.f32 1.442695, %v1078_v58 }
 0x70e   : > { %v1066_v60 = vpop.permute.xlu0 %1065 }
 0x70f   : > { %2123 = vpow2.f32 %v1082_v59  ;;  %v1079_v61 = vsub.f32 %v896_v21, %v1066_v60 }
 0x711   : > { %v1084_v62 = vmul.f32 1.442695, %v1079_v61 }
 0x712   : > { %v1071_v63 = vpop.permute.xlu1 %1070 }
 0x713   : > { %2125 = vpow2.f32 %v1084_v62  ;;  %v1080_v0 = vsub.f32 %v958_v27, %v1071_v63  ;;  %v1094_v27 = vmul.f32 %v2122_v55, %v1090_v26  ;;  %v1310_v62 = vld [vmem:[#allocation5 + $0x18] sm:$0xff]  ;;  %v1392_v26 = vld [vmem:[#allocation14 + $0x4] sm:$0xf] (!%p1798_p4) }
 0x715   : > { %v1086_v1 = vmul.f32 1.442695, %v1080_v0 }
 0x716   : > { %v1076_v2 = vpop.permute.xlu1 %1075 }
 0x717   : > { %2127 = vpow2.f32 %v1086_v1  ;;  %v1081_v3 = vsub.f32 %v1020_v31, %v1076_v2 }
 0x719   : > { %v2124_v5 = vpop.eup %2123  ;;  %v1088_v6 = vmul.f32 1.442695, %v1081_v3 }
 0x71a   : > { %v1098_v7 = vsel %vm792_vm7, %v2124_v5, 0.0  ;;  %v1119_v8 = vpack.c.bf16 %v2124_v5, %v2124_v5  ;;  %v1314_v28 = vpop.permute.xlu1 %1313 }
 0x71b   : > { %2129 = vpow2.f32 %v1088_v6  ;;  %1099 = vadd.xlane.f32.xlu0 %v1098_v7  ;;  %v1331_v44 = vmul.f32 %v1314_v28, %v1307_v43 }
 0x71c   : > { %1887 = vmatmul.mubr.msk.bf16.vlgmr.msra.gmra.mrb[12].mxu0 %vm792_vm7, %v1119_v8  ;;  %2131 = vpow2.f32 %v1054_v17 }
 0x71d   : > { %v2126_v13 = vpop.eup %2125  ;;  %1897 = vmatpush3.bf16.xpose.msra.mxu0 %v1219_v10  ;;  %1898 = vmatprep.mubr.msk.bf16.mxu0 %vm2453_vm5, %v2452_v56  ;;  %2133 = vpow2.f32 %v1056_v20 }
 0x71e   : > { %v1101_v9 = vsel %vm792_vm7, %v2126_v13, 0.0  ;;  %v1120_v14 = vpack.c.bf16 %v2126_v13, %v2126_v13 }
 0x71f   : > { %1102 = vadd.xlane.f32.xlu1 %v1101_v9 }
 0x720   : > { %1893 = vmatmul.mubr.msk.bf16.vlgmr.msra.gmra.mrb[12].mxu1 %vm792_vm7, %v1120_v14 }
 0x721   : > { %v2128_v16 = vpop.eup %2127  ;;  %1903 = vmatpush3.bf16.xpose.msra.mxu1 %v1265_v15  ;;  %1904 = vmatprep.mubr.msk.bf16.mxu1 %vm2453_vm5, %v2452_v56  ;;  %v1052_v56 = vmul.f32 1.442695, %v1047_v47  ;;  %v2455_v15 = vmov (!%p1798_p4), 0  }
 0x722   : > { %v1104_v12 = vsel %vm792_vm7, %v2128_v16, 0.0  ;;  %v1121_v18 = vpack.c.bf16 %v2128_v16, %v2128_v16 }
 0x723   : > { %1105 = vadd.xlane.f32.xlu0 %v1104_v12  ;;  %2135 = vpow2.f32 %v1052_v56  ;;  %v1391_v12 = vld [vmem:[#allocation14] sm:$0xf] (!%p1798_p4)  ;;  %v1393_v56 = vld [vmem:[#allocation14 + $0x8] sm:$0xf] (!%p1798_p4) }
 0x724   : > { %1899 = vmatmul.mubr.msk.bf16.vlgmr.msra.gmra.mrb[16].mxu0 %vm792_vm7, %v1121_v18  ;;  %v1408_v20 = vsel (!%p1798_p4), %vm796_vm6, %v1391_v12, 0 }
 0x725   : > { %v2130_v19 = vpop.eup %2129 }
 0x726   : > { %v1107_v21 = vsel %vm792_vm7, %v2130_v19, 0.0  ;;  %v1122_v22 = vpack.c.bf16 %v2130_v19, %v2130_v19  ;;  %v2132_v23 = vpop.eup %2131  ;;  %v2456_v19 = vmov (!%p1798_p4), 0.0  }
 0x727   : > { %1108 = vadd.xlane.f32.xlu0 %v1107_v21  ;;  %v2134_v24 = vpop.eup %2133  ;;  %v1096_v36 = vmul.f32 %v2132_v23, %v1092_v34  ;;  %1908 = vmatprep.subr.bf16.mxu1 (!%p1798_p4), %v2456_v19 }
 0x728   : > { %1905 = vmatmul.mubr.msk.bf16.vlgmr.msra.gmra.mrb[16].mxu1 %vm792_vm7, %v1122_v22  ;;  %v1097_v40 = vmul.f32 %v2134_v24, %v1093_v38  ;;  %1920 = vmatprep.subr.bf16.mxu0 (!%p1798_p4), %v2456_v19 }
 0x729   : > { %1909 = vmatpush3.bf16.msra.mxu1 (!%p1798_p4), %v1408_v20  ;;  %1910 = vmatprep.mubr.msk.bf16.mxu1 (!%p1798_p4), %vm2457_vm9, %v2456_v19 }
 0x72a   : > { %1914 = vmatprep.subr.bf16.mxu1 (!%p1798_p4), %v2456_v19  ;;  %1922 = vmatprep.mubr.msk.bf16.mxu0 (!%p1798_p4), %vm2457_vm9, %v2456_v19 }
 0x72d   : > { %v2136_v25 = vpop.eup %2135 }
 0x72e   : > { %v1095_v32 = vmul.f32 %v2136_v25, %v1091_v30  ;;  %v1455_v30 = vsel (!%p1798_p4), %vm796_vm6, %v1392_v26, 0 }
 0x730   : > { %1323 = vperm.xlu1 %2113, %v2132_v23   ;;  %v1502_v23 = vsel (!%p1798_p4), %vm796_vm6, %v1393_v56, 0 }
 0x731   : > { %1921 = vmatpush3.bf16.msra.mxu0 (!%p1798_p4), %v1502_v23 }
 0x732   : > { %1926 = vmatprep.subr.bf16.mxu0 (!%p1798_p4), %v2456_v19 }
 0x734   : > { %1328 = vperm.xlu1 %2113, %v2134_v24  }
 0x738   : > { %2138 = vset.pattern.permute.xlu1 (!%p1798_p4), %v2455_v15 }
 0x73d   : > { %1318 = vperm.xlu0 %2114, %v2136_v25  }
 0x741   : > { %2137 = vset.pattern.permute.xlu0 (!%p1798_p4), %v2455_v15 }
 0x7a8   : > { %v1100_v29 = vpop.xlane.xlu0 %1099 }
 0x7a9   : > { %v1110_v31 = vadd.f32 %v1100_v29, %v1094_v27 }
 0x7ab   : > { %1115 = vst.msk [vmem:[#allocation4] sm:$0xff] %vm1114_vm8, %v1110_v31 }
 0x7ac   : > { %v1103_v33 = vpop.xlane.xlu1 %1102 }
 0x7ad   : > { %v1111_v35 = vadd.f32 %v1103_v33, %v1095_v32  ;;  %v1394_v32 = vld [vmem:[#allocation14 + $0xc] sm:$0xf] (!%p1798_p4) }
 0x7af   : > { %1116 = vst.msk [vmem:[#allocation4 + $0x8] sm:$0xff] %vm1114_vm8, %v1111_v35 }
 0x7b0   : > { %v1106_v37 = vpop.xlane.xlu0 %1105  ;;  %v1324_v50 = vpop.permute.xlu1 %1323 }
 0x7b1   : > { %v1112_v39 = vadd.f32 %v1106_v37, %v1096_v36  ;;  %v1333_v60 = vmul.f32 %v1324_v50, %v1309_v54  ;;  %v1549_v37 = vsel (!%p1798_p4), %vm796_vm6, %v1394_v32, 0 }
 0x7b2   : > { %v1355_v13 = vld [vmem:[#allocation4] sm:$0xff] (!%p1798_p4) }
 0x7b3   : > { %1117 = vst.msk [vmem:[#allocation4 + $0x10] sm:$0xff] %vm1114_vm8, %v1112_v39  ;;  %2139 = vrcp.f32 (!%p1798_p4), %v1355_v13 }
 0x7b4   : > { %v1109_v41 = vpop.xlane.xlu0 %1108  ;;  %v1329_v63 = vpop.permute.xlu1 %1328 }
 0x7b5   : > { %v1113_v42 = vadd.f32 %v1109_v41, %v1097_v40  ;;  %v1334_v4 = vmul.f32 %v1329_v63, %v1310_v62 }
 0x7b6   : > { %v1356_v14 = vld [vmem:[#allocation4 + $0x8] sm:$0xff] (!%p1798_p4) }
 0x7b7   : > { %1118 = vst.msk [vmem:[#allocation4 + $0x18] sm:$0xff] %vm1114_vm8, %v1113_v42 }
 0x7ba   : > { %v1357_v9 = vld [vmem:[#allocation4 + $0x10] sm:$0xff] (!%p1798_p4) }
 0x7bb   : > { %2141 = vrcp.f32 (!%p1798_p4), %v1357_v9 }
 0x7bc   : > { %v1319_v46 = vpop.permute.xlu0 %1318  ;;  %2143 = vrcp.f32 (!%p1798_p4), %v1356_v14 }
 0x7bd   : > { %v1332_v52 = vmul.f32 %v1319_v46, %v1308_v45  ;;  %v2140_v17 = vpop.eup (!%p1798_p4), %2139  ;;  %v1799_v45 = vld [vmem:[%s3166_s29] ss:$0 sm:$0xff] (!%p1798_p4) }
 0x7be   : > { %v1358_v16 = vld [vmem:[#allocation4 + $0x18] sm:$0xff] (!%p1798_p4)  ;;  %1365 = vperm.xlu0 (!%p1798_p4), %2137, %v2140_v17  }
 0x7bf   : > { %2145 = vrcp.f32 (!%p1798_p4), %v1358_v16 }
 0x7c5   : > { %v2142_v18 = vpop.eup (!%p1798_p4), %2141 }
 0x7c6   : > { %v2144_v21 = vpop.eup (!%p1798_p4), %2143  ;;  %1375 = vperm.xlu0 (!%p1798_p4), %2137, %v2142_v18  }
 0x7c7   : > { %1370 = vperm.xlu1 (!%p1798_p4), %2138, %v2144_v21  }
 0x7c9   : > { %v2146_v22 = vpop.eup (!%p1798_p4), %2145 }
 0x7cb   : > { %1380 = vperm.xlu1 (!%p1798_p4), %2138, %v2146_v22  }
 0x7ef   : > { %v1163_v47 = vpop.f32.mrb[12].mxu0 }
 0x7f0   : > { %v1335_v48 = vadd.f32 %v1331_v44, %v1163_v47  ;;  %v1888_v49 = vpop.f32.mrb[13].mxu0  ;;  %v1395_v44 = vld [vmem:[%s2854_s3] sm:$0xff] (!%p1798_p4) }
 0x7f1   : > { %v1166_v51 = vpop.f32.mrb[14].mxu0  ;;  %v1403_v46 = vadd.f32 (!%p1798_p4), %v1799_v45, %v1395_v44 }
 0x7f2   : > { %1339 = vst.msk [vmem:[#allocation5] sm:$0xff] %vm792_vm7, %v1335_v48  ;;  %v1889_v53 = vpop.f32.mrb[15].mxu0 }
 0x7f3   : > { %v1209_v55 = vpop.f32.mrb[12].mxu1 }
 0x7f4   : > { %v1336_v57 = vadd.f32 %v1332_v52, %v1209_v55  ;;  %v1894_v58 = vpop.f32.mrb[13].mxu1 }
 0x7f5   : > { %v1212_v59 = vpop.f32.mrb[14].mxu1 }
 0x7f6   : > { %1340 = vst.msk [vmem:[#allocation5 + $0x8] sm:$0xff] %vm792_vm7, %v1336_v57  ;;  %v1895_v61 = vpop.f32.mrb[15].mxu1 }
 0x7f7   : > { %v1255_v0 = vpop.f32.mrb[16].mxu0 }
 0x7f8   : > { %v1337_v1 = vadd.f32 %v1333_v60, %v1255_v0  ;;  %v1900_v2 = vpop.f32.mrb[17].mxu0  ;;  %1350 = sbr.rel (%p1798_p4) target bundleno = 2349 (0x92d), region = 84 }
 0x7f9   : > { %v1258_v3 = vpop.f32.mrb[18].mxu0  ;;  %v1351_v24 = vld [vmem:[#allocation5] sm:$0xff] (!%p1798_p4) }
 0x7fa   : > { %1341 = vst.msk [vmem:[#allocation5 + $0x10] sm:$0xff] %vm792_vm7, %v1337_v1  ;;  %v1901_v5 = vpop.f32.mrb[19].mxu0 }
 0x7fb   : > { %v1301_v6 = vpop.f32.mrb[16].mxu1 }
 0x7fc   : > { %v1338_v7 = vadd.f32 %v1334_v4, %v1301_v6  ;;  %v1906_v8 = vpop.f32.mrb[17].mxu1 }
 0x7fd   : > { %v1304_v10 = vpop.f32.mrb[18].mxu1  ;;  %v1352_v35 = vld [vmem:[#allocation5 + $0x8] sm:$0xff] (!%p1798_p4) }
 0x7fe   : > { %1342 = vst.msk [vmem:[#allocation5 + $0x18] sm:$0xff] %vm792_vm7, %v1338_v7  ;;  %v1907_v11 = vpop.f32.mrb[19].mxu1 }
 0x801   : > { %v1353_v28 = vld [vmem:[#allocation5 + $0x10] sm:$0xff] }
 0x805   : > { %v1354_v40 = vld [vmem:[#allocation5 + $0x18] sm:$0xff] }
 0x83d   : > { %v1366_v25 = vpop.permute.xlu0 %1365 }
 0x83e   : > { %v1383_v27 = vmul.f32 %v1366_v25, %v1351_v24 }
 0x840   : > { %v1387_v29 = vpack.c.bf16 %v1383_v27, %v1383_v27 }
 0x842   : > { %1911 = vmatmul.mubr.msk.bf16.vlgmr.msra.gmra.mrb[0].mxu1 %vm792_vm7, %v1387_v29 }
 0x843   : > { %1915 = vmatpush3.bf16.msra.mxu1 %v1455_v30  ;;  %1916 = vmatprep.mubr.msk.bf16.mxu1 %vm2457_vm9, %v2456_v19 }
 0x845   : > { %v1376_v31 = vpop.permute.xlu0 %1375 }
 0x846   : > { %v1385_v33 = vmul.f32 %v1376_v31, %v1353_v28  ;;  %v1371_v34 = vpop.permute.xlu1 %1370 }
 0x847   : > { %v1384_v38 = vmul.f32 %v1371_v34, %v1352_v35 }
 0x848   : > { %v1389_v36 = vpack.c.bf16 %v1385_v33, %v1385_v33 }
 0x849   : > { %v1388_v41 = vpack.c.bf16 %v1384_v38, %v1384_v38 }
 0x84a   : > { %1923 = vmatmul.mubr.msk.bf16.vlgmr.msra.gmra.mrb[0].mxu0 %vm792_vm7, %v1389_v36  ;;  %v1381_v39 = vpop.permute.xlu1 %1380 }
 0x84b   : > { %1927 = vmatpush3.bf16.msra.mxu0 %v1549_v37  ;;  %1928 = vmatprep.mubr.msk.bf16.mxu0 %vm2457_vm9, %v2456_v19  ;;  %v1386_v42 = vmul.f32 %v1381_v39, %v1354_v40 }
 0x84d   : > { %v1390_v43 = vpack.c.bf16 %v1386_v42, %v1386_v42 }
 0x84e   : > { %1917 = vmatmul.mubr.msk.bf16.vlgmr.msra.gmra.mrb[0].mxu1 %vm792_vm7, %v1388_v41 }
 0x856   : > { %1929 = vmatmul.mubr.msk.bf16.vlgmr.msra.gmra.mrb[0].mxu0 %vm792_vm7, %v1390_v43 }
 0x921   : > { %v1491_v47 = vpop.f32.mrb[0].mxu1 }
 0x922   : > { %v1918_v48 = vpop.f32.mrb[1].mxu1  ;;  %v1932_v50 = vadd.f32 %v1491_v47, %v1403_v46 }
 0x923   : > { %v1494_v49 = vpop.f32.mrb[2].mxu1 }
 0x924   : > { %v1919_v51 = vpop.f32.mrb[3].mxu1 }
 0x929   : > { %v1585_v52 = vpop.f32.mrb[0].mxu0 }
 0x92a   : > { %v1933_v53 = vadd.f32 %v1932_v50, %v1585_v52  ;;  %v1930_v54 = vpop.f32.mrb[1].mxu0 }
 0x92b   : > { %v1588_v55 = vpop.f32.mrb[2].mxu0 }
 0x92c   : > { %1592 = vst.msk [vmem:[%s2877_s16] sm:$0xff] %vm593_vm4, %v1933_v53  ;;  %v1931_v57 = vpop.f32.mrb[3].mxu0 }
 0x92d PF: > { %s3167_s30 = sld [smem:[#allocation24_spill]]  ;;  %s3168_s3 = sld [smem:[#allocation23_spill]] }
 0x92e   : > { %s3169_s25 = sld [smem:[#allocation28_spill]]  ;;  %s1609_s2 = sshll.u32 %s2877_s16, 4  ;;  %s3018_s2 = int_to_ptr.vmem [resolvable:$true] %s1609_s2 }
 0x92f   : > { %s3170_s22 = sld [smem:[#allocation38_spill]]  ;;  %s1594_s23 = scalar_lea.sflag [#allocation8], %s2850_s5 }
 0x930   : > { %s2291_s17 = scalar_lea.vmem %s3018_s2, 128  ;;  %s2458_s27 = smov [#allocation15]  }
 0x931   : > { %p2292_p7 = scmp.ne.s32.totalorder %s3018_s2, %s2291_s17  ;;  %s2295_s29 = sshll.u32 %s2458_s27, 4  ;;  %s2296_s29 = int_to_ptr.vmem [resolvable:$false] %s2295_s29 }
 0x932   : > { %s2297_s16 = scalar_lea.vmem %s2296_s29, 256  ;;  %p2298_p8 = scmp.lt.s32.totalorder %s3018_s2, %s2296_s29 }
 0x933   : > { %s1805_s24 = sshll.u32 %s3167_s30, 1  ;;  %p2299_p10 = scmp.lt.s32.totalorder %s2297_s16, %s2291_s17 }
 0x934   : > { %s1605_s28 = sadd.s32 %s3168_s3, %s1805_s24  ;;  %p3171_p2 = scmp.ne.s32.totalorder %s3169_s25, 0 }
 0x935   : > { %s1806_s6 = sshll.u32 %s1605_s28, 7  ;;  %p2300_p9 = por %p2299_p10, %p2298_p8 }
 0x936   : > { %s1607_s9 = scalar_lea.hbm %s3170_s22, %s1806_s6  ;;  %p2293_p6 = pnand %p2292_p7, %p3171_p2 }
 0x938   : > { %p2294_p5 = pneg %p2293_p6 }
 0x93a   : > { %p2301_p1 = pnand %p2300_p9, %p2294_p5 }
 0x93c   : > { %2304 = shalt.err (!%p2301_p1)
}
 0x93d   : > { %s2305_s30 = scalar_lea.hbm %s1607_s9, 128  ;;  %s2309_s24 = scalar_lea.hbm %s3170_s22, 512 }
 0x93e   : > { %p2306_p11 = scmp.ne.s32.totalorder %s1607_s9, %s2305_s30  ;;  %p2310_p3 = scmp.lt.u32.totalorder %s1607_s9, %s3170_s22 }
 0x93f   : > { %p2311_p13 = scmp.lt.u32.totalorder %s2309_s24, %s2305_s30  ;;  %p2313_p7 = scmp.lt.u32.totalorder %s2305_s30, %s1607_s9 }
 0x940   : > { %p2307_p0 = pnand %p2306_p11, %p3171_p2 }
 0x941   : > { %p2312_p4 = por %p2311_p13, %p2310_p3 }
 0x942   : > { %p2308_p12 = pneg %p2307_p0 }
 0x943   : > { %p2314_p6 = por %p2313_p7, %p2312_p4 }
 0x945   : > { %p2315_p5 = pnand %p2314_p6, %p2308_p12 }
 0x947   : > { %2318 = shalt.err (!%p2315_p5)
}
 0x948   : > { %1961 = dma.vmem_to_hbm [thread:$0]  (%p3171_p2), %s3018_s2, 128, %s1607_s9, %s1594_s23  }
 0x949 PF: > { %s3172_s7 = sld [smem:[#allocation21_spill]]  ;;  %s3173_s8 = sld [smem:[#allocation29_spill]] }
 0x94a   : > { %p1991_p8 = scmp.ge.s32.totalorder %s2441_s21, 2 }
 0x94f   : > { %s1621_s17 = sand.u32 1, %s3172_s7   ;;  %p3174_p10 = scmp.ne.s32.totalorder %s3173_s8, 0 }
 0x950   : > { %s1622_s27 = scalar_lea.sflag [#allocation8], %s1621_s17 }
 0x951   : > { %p1981_p9 = pnand %p1991_p8, %p3174_p10 }
 0x953   : > { %2388 = dma.done.wait (!%p1981_p9), %s1622_s27, 128  }
 0x954   : > { %2390 = vsyncadd (!%p1981_p9), %s1622_s27, 4294967168  ;;  %s29_s21 = sadd.s32 1, %s2441_s21   ;;  %s3176_s25 = sld [smem:[#allocation26_spill]] }
 0x955   : > { %p3045_p1 = scmp.ge.s32.totalorder %s29_s21, 10   ;;  %s3177_s2 = sld [smem:[#allocation27_spill]] }
 0x956   : > { %s3178_s9 = smov %s3200_s15  ;;  %s3179_s30 = smov %s2397_s10 }
 0x957   : > { %s3180_s10 = smov %s2401_s11  ;;  %s3181_s11 = smov %s2792_s12 }
 0x958   : > { %s3182_s12 = smov %s2409_s13  ;;  %s3183_s13 = smov %s2413_s14 }
 0x959   : > { %s3184_s14 = smov %s2742_s4  ;;  %s3185_s15 = smov %s2429_s18 }
 0x95a   : > { %s3186_s16 = smov %s2433_s19  ;;  %s3187_s17 = smov %s2437_s20 }
 0x95b   : > { %s3188_s18 = smov %s3176_s25  ;;  %s3189_s19 = smov %s3177_s2 }
 0x95c   : > { %s3190_s20 = smov %s3178_s9  ;;  %28 = sbr.rel (!%p3045_p1) target bundleno = 23 (0x17), region = 134 }
 0x963   :  { %1627 = vsyncpa [#allocation7], 1 }
 0x964   :  { %1629 = vsyncpa [#allocation7 + $0x1], 1 }
 0x965   :  { %1630 = vsyncpa [#allocation10], 1 }
 0x966   :  { %1632 = vsyncpa [#allocation10 + $0x1], 1 }
 0x967   :  { %1633 = vsyncpa [#allocation13], 1 }
 0x968   :  { %1634 = vsyncpa [#allocation8], 1 }
 0x969   :  { %1636 = vsyncpa [#allocation8 + $0x1], 1 }

</bundles_post_ra>
